<compile_context>
chip_gen: v7x
topology: tpu7x:2x2x1
jax: 0.10.0
libtpu: 0.0.40
codegen_flags: <defaults>
</compile_context>

<pallas_src>
import functools

import jax
import jax.numpy as jnp
import numpy as np
from jax.experimental import pallas as pl
from jax.experimental.pallas import tpu as pltpu


def _boundary_kernel(pred_ref, gt_ref, o_ref, *, C, W, H, tH, halo, theta0, theta):
    """One (image n, H-tile h) grid step.

    pred_ref: (1, 1, T, C*W) f32 channel-fused logits tile, T = tH + 2*halo.
    gt_ref:   (1, 1, T, W)   int32 label tile.
    o_ref:    (1, 1, 4, C*W) f32 per-lane partial sums over this tile's owned
              rows: [pred_b*gt_b_ext, pred_b, pred_b_ext*gt_b, gt_b].
    """
    x = pred_ref[0, 0]                    # (T, CW) f32 logits
    gt = gt_ref[0, 0]                     # (T, W)  int32 labels
    T, CW = x.shape
    f32 = jnp.float32

    # ---- hoisted index vectors & masks (emitted exactly once per step) ----
    lane = jax.lax.broadcasted_iota(jnp.int32, (1, CW), 1)
    w_in_seg = jnp.concatenate(                                   # lane % W
        [jax.lax.broadcasted_iota(jnp.int32, (1, W), 1)] * C, axis=1)
    h_loc = jax.lax.broadcasted_iota(jnp.int32, (T, 1), 0)

    # global row of each tile row; rows outside [0, H) are zero-padded halo.
    g_row = pl.program_id(1) * tH + h_loc - halo
    valid_row = jnp.logical_and(g_row >= 0, g_row < H)            # (T, 1)
    # rows this tile is responsible for summing (tile interior, inside image).
    owned = jnp.logical_and(valid_row,
                            jnp.logical_and(h_loc >= halo, h_loc < halo + tH))
    owned_f = owned.astype(f32)

    # hoisted W-shift validity masks, reused by all four max pools
    max_pad = max((theta0 - 1) // 2, (theta - 1) // 2)
    vw = {}
    for d in range(1, max_pad + 1):
        vw[d] = w_in_seg < (W - d)
        vw[-d] = w_in_seg >= d

    # ---- softmax over channels, fused layout, log2 roll tree ----
    # Rolls by multiples of W visit channel segments at fixed w.  The max is
    # overlap-tolerant doubling; the sum uses a disjoint binary decomposition
    # of C, so each channel is counted exactly once (works for any C).
    m = x
    span = 1
    while span < C:
        d = min(span, C - span)
        m = jnp.maximum(m, pltpu.roll(m, (d * W) % CW, axis=1))
        span += d
    e = jnp.exp(x - m)
    s = None
    p = e
    pspan = 1
    off = 0
    c_rem = C
    while c_rem > 0:
        if c_rem & 1:
            term = p if off == 0 else pltpu.roll(p, (off * W) % CW, axis=1)
            s = term if s is None else s + term
            off += pspan
        c_rem >>= 1
        if c_rem:
            p = p + pltpu.roll(p, (pspan * W) % CW, axis=1)
            pspan *= 2

    # ---- separable kxk max pool (stride 1, 'same') via roll + mask ----
    # NOTE: the zero fill is exact ONLY because every pooled tensor is >= 0 and
    # the always-in-bounds window centre is part of the max.  Do not reuse this
    # maxpool on signed data.
    def shift_w(v, d):
        r = pltpu.roll(v, (-d) % CW, axis=1)
        return jnp.where(vw[d], r, 0.0)

    def shift_h(v, d):
        # No mask: the halo guarantees every tap needed by an owned row stays
        # inside the tile; wrap-around only contaminates rows that are neither
        # owned nor multiplied against non-zero owned data.
        return pltpu.roll(v, (-d) % T, axis=0)

    def maxpool(v, k):
        pd = (k - 1) // 2
        row = v                            # 1xk pass along W
        for d in range(1, pd + 1):
            row = jnp.maximum(row, shift_w(v, d))
            row = jnp.maximum(row, shift_w(v, -d))
        out = row                          # kx1 pass along H
        for d in range(1, pd + 1):
            out = jnp.maximum(out, shift_h(row, d))
            out = jnp.maximum(out, shift_h(row, -d))
        return out

    # ---- boundary maps (oh / sm never materialized; OOB rows forced to 0) ----
    gt_rep = jnp.concatenate([gt] * C, axis=1)                    # (T, CW)
    lo = gt_rep * W
    # Labels outside [0, C) give an all-zero one-hot (matches jax.nn.one_hot /
    # the JAX reference; PyTorch F.one_hot would raise).
    inv_oh = jnp.logical_and(
        jnp.logical_or(lane < lo, lane >= lo + W), valid_row).astype(f32)
    inv_sm = jnp.where(valid_row, 1.0 - e / s, 0.0)

    gt_b = jnp.where(valid_row, maxpool(inv_oh, theta0) - inv_oh, 0.0)
    gt_b_ext = maxpool(gt_b, theta)

    pred_b = jnp.where(valid_row, maxpool(inv_sm, theta0) - inv_sm, 0.0)

    # consume gt_b_ext before building pred_b_ext -> lower peak live set
    pred_b_own = pred_b * owned_f
    s1 = jnp.sum(pred_b_own * gt_b_ext, axis=0, keepdims=True)    # (1, CW)
    s2 = jnp.sum(pred_b_own, axis=0, keepdims=True)

    pred_b_ext = maxpool(pred_b, theta)
    gt_b_own = gt_b * owned_f
    s3 = jnp.sum(pred_b_ext * gt_b_own, axis=0, keepdims=True)
    s4 = jnp.sum(gt_b_own, axis=0, keepdims=True)

    # single fused output block (one write-back DMA per step)
    o_ref[0, 0, 0:1, :] = s1
    o_ref[0, 0, 1:2, :] = s2
    o_ref[0, 0, 2:3, :] = s3
    o_ref[0, 0, 3:4, :] = s4


def _vmem_capacity_bytes():
    try:
        return int(pltpu.get_tpu_info().vmem_capacity_bytes)
    except Exception:
        return 64 * 2 ** 20            # conservative (v7x-sized) fallback


def boundary_loss(pred, gt, theta0=3, theta=5, tile_h=None):
    """pred: (N, C, H, W) float logits; gt: (N, H, W) integer labels."""
    assert theta0 % 2 == 1 and theta % 2 == 1, "kernel assumes odd pool sizes"
    N, C, H, W = pred.shape
    CW = C * W
    halo = (theta0 - 1) // 2 + (theta - 1) // 2     # rows of context each side

    # Per-generation scoped-VMEM cap: ~85% of physical (=> ~54 MiB on v7x's
    # 64 MiB, ~109 MiB on v5e/v6e's 128 MiB), never above 112 MiB.
    vmem_cap = _vmem_capacity_bytes()
    vmem_limit = int(min(112 * 2 ** 20, 0.85 * vmem_cap))

    # ---- H-tile size: bound the per-step working set to a VMEM budget ----
    if tile_h is None:
        live_arrays = 14                            # ~live (T, CW) f32 temps
        budget = int(0.45 * vmem_limit)             # rest: pipelined I/O
        tile_h = budget // (live_arrays * CW * 4) - 2 * halo
        tile_h = min(tile_h, 128 if vmem_cap > 80 * 2 ** 20 else 64)
    tile_h = max(8, (int(tile_h) // 8) * 8)
    tile_h = min(tile_h, ((H + 7) // 8) * 8)        # never bigger than (padded) H
    tH = tile_h
    nH = -(-H // tH)
    T = tH + 2 * halo

    f32 = jnp.float32
    # Lane-dense, channel-fused layout (N, H, C*W); done once in XLA.
    pred_t = jnp.transpose(pred.astype(f32), (0, 2, 1, 3)).reshape(N, H, CW)
    gt_i = gt.astype(jnp.int32)

    # Build halo'd, overlapping H tiles in XLA (stride tH, window T).  This
    # duplicates 2*halo rows per tile in HBM (~2*halo/tH extra read traffic)
    # but keeps BlockSpec tiling simple + pipelined and makes every grid step
    # independent, so both grid axes can be 'parallel' (v7x dual-TC for N==1).
    pad_hi = nH * tH + halo - H
    pred_pad = jnp.pad(pred_t, ((0, 0), (halo, pad_hi), (0, 0)))
    gt_pad = jnp.pad(gt_i, ((0, 0), (halo, pad_hi), (0, 0)))
    win = np.arange(nH)[:, None] * tH + np.arange(T)[None, :]      # (nH, T)
    pred_tiles = pred_pad[:, win, :]            # (N, nH, T, CW)
    gt_tiles = gt_pad[:, win, :]                # (N, nH, T, W)

    kern = functools.partial(_boundary_kernel, C=C, W=W, H=H, tH=tH,
                             halo=halo, theta0=theta0, theta=theta)

    partials = pl.pallas_call(
        kern,
        out_shape=jax.ShapeDtypeStruct((N, nH, 4, CW), f32),
        grid=(N, nH),
        in_specs=[
            pl.BlockSpec((1, 1, T, CW), lambda n, h: (n, h, 0, 0)),
            pl.BlockSpec((1, 1, T, W), lambda n, h: (n, h, 0, 0)),
        ],
        out_specs=pl.BlockSpec((1, 1, 4, CW), lambda n, h: (n, h, 0, 0)),
        compiler_params=pltpu.CompilerParams(
            dimension_semantics=("parallel", "parallel"),
            vmem_limit_bytes=vmem_limit,
        ),
    )(pred_tiles, gt_tiles)

    # ---- tiny XLA glue: fold tiles + W segments and apply the BF1 formula ----
    sums = jnp.sum(partials, axis=1)                     # (N, 4, CW)
    sums = jnp.sum(sums.reshape(N, 4, C, W), axis=-1)    # (N, 4, C)
    s_pb_gbe, s_pb, s_pbe_gb, s_gb = (sums[:, i] for i in range(4))
    P = s_pb_gbe / (s_pb + 1e-7)
    R = s_pbe_gb / (s_gb + 1e-7)
    BF1 = 2.0 * P * R / (P + R + 1e-7)
    return jnp.mean(1.0 - BF1)


# ----- pure-JAX reference (for validation only) -----
def _maxpool_ref(x, k):
    pad = (k - 1) // 2
    return jax.lax.reduce_window(
        x, -jnp.inf, jax.lax.max,
        (1, 1, k, k), (1, 1, 1, 1),
        [(0, 0), (0, 0), (pad, pad), (pad, pad)],
    )


def boundary_loss_ref(pred, gt, theta0=3, theta=5):
    n, c, _, _ = pred.shape
    sm = jax.nn.softmax(pred, axis=1)
    oh = jax.nn.one_hot(gt, c, dtype=pred.dtype).transpose(0, 3, 1, 2)
    gt_b = _maxpool_ref(1 - oh, theta0) - (1 - oh)
    pred_b = _maxpool_ref(1 - sm, theta0) - (1 - sm)
    gt_b_ext = _maxpool_ref(gt_b, theta)
    pred_b_ext = _maxpool_ref(pred_b, theta)
    gt_b = gt_b.reshape(n, c, -1)
    pred_b = pred_b.reshape(n, c, -1)
    gt_b_ext = gt_b_ext.reshape(n, c, -1)
    pred_b_ext = pred_b_ext.reshape(n, c, -1)
    P = jnp.sum(pred_b * gt_b_ext, axis=2) / (jnp.sum(pred_b, axis=2) + 1e-7)
    R = jnp.sum(pred_b_ext * gt_b, axis=2) / (jnp.sum(gt_b, axis=2) + 1e-7)
    BF1 = 2 * P * R / (P + R + 1e-7)
    return jnp.mean(1 - BF1)


if __name__ == "__main__":
    key = jax.random.PRNGKey(0)
    k1, k2, k3, k4, k5, k6 = jax.random.split(key, 6)

    # primary shape (single H tile)
    N, C, H, W = 2, 4, 16, 16
    pred = jax.random.normal(k1, (N, C, H, W), dtype=jnp.float32)
    gt = jax.random.randint(k2, (N, H, W), 0, C, dtype=jnp.int32)
    loss = boundary_loss(pred, gt)
    jax.block_until_ready(loss)
    ref = boundary_loss_ref(pred, gt)
    np.testing.assert_allclose(float(loss), float(ref), rtol=1e-4, atol=1e-5)

    # awkward sizes: non-power-of-two C / W, different H
    N2, C2, H2, W2 = 1, 3, 24, 20
    pred2 = jax.random.normal(k3, (N2, C2, H2, W2), dtype=jnp.float32)
    gt2 = jax.random.randint(k4, (N2, H2, W2), 0, C2, dtype=jnp.int32)
    loss2 = boundary_loss(pred2, gt2)
    jax.block_until_ready(loss2)
    ref2 = boundary_loss_ref(pred2, gt2)
    np.testing.assert_allclose(float(loss2), float(ref2), rtol=1e-4, atol=1e-5)

    # multi-H-tile path: 3 tiles of 16 rows (last one partial), exercising the
    # halo gather, valid/owned masking and cross-tile partial-sum folding.
    N3, C3, H3, W3 = 1, 4, 40, 16
    pred3 = jax.random.normal(k5, (N3, C3, H3, W3), dtype=jnp.float32)
    gt3 = jax.random.randint(k6, (N3, H3, W3), 0, C3, dtype=jnp.int32)
    loss3 = boundary_loss(pred3, gt3, tile_h=16)
    jax.block_until_ready(loss3)
    ref3 = boundary_loss_ref(pred3, gt3)
    np.testing.assert_allclose(float(loss3), float(ref3), rtol=1e-4, atol=1e-5)

    print("KERNEL_OK")
</pallas_src>

<mosaic_0001>
module attributes {stable_mosaic.version = 11 : i64} {
  func.func @_boundary_kernel(%arg0: i32, %arg1: i32, %arg2: memref<1x1x22x64xf32, #tpu.memory_space<vmem>>, %arg3: memref<1x1x22x16xi32, #tpu.memory_space<vmem>>, %arg4: memref<1x1x4x64xf32, #tpu.memory_space<vmem>>) attributes {dimension_semantics = [#tpu.dimension_semantics<parallel>, #tpu.dimension_semantics<parallel>], iteration_bounds = array<i64: 2, 1>, scalar_prefetch = 0 : i64, scratch_operands = 0 : i64, tpu.core_type = #tpu.core_type<tc>, window_params = [{transform_indices = @transform_0, window_bounds = array<i64: 1, 1, 22, 64>}, {transform_indices = @transform_1, window_bounds = array<i64: 1, 1, 22, 16>}, {transform_indices = @transform_2, window_bounds = array<i64: 1, 1, 4, 64>}]} {
    %c0 = arith.constant 0 : index
    %c0_0 = arith.constant 0 : index
    %c0_1 = arith.constant 0 : index
    %c0_2 = arith.constant 0 : index
    %0 = vector.load %arg2[%c0, %c0_0, %c0_1, %c0_2] : memref<1x1x22x64xf32, #tpu.memory_space<vmem>>, vector<1x1x22x64xf32>
    %1 = vector.shape_cast %0 : vector<1x1x22x64xf32> to vector<22x64xf32>
    %c0_3 = arith.constant 0 : index
    %c0_4 = arith.constant 0 : index
    %c0_5 = arith.constant 0 : index
    %c0_6 = arith.constant 0 : index
    %2 = vector.load %arg3[%c0_3, %c0_4, %c0_5, %c0_6] : memref<1x1x22x16xi32, #tpu.memory_space<vmem>>, vector<1x1x22x16xi32>
    %3 = vector.shape_cast %2 : vector<1x1x22x16xi32> to vector<22x16xi32>
    %4 = tpu.iota {dimensions = array<i32: 1>} : vector<1x64xi32>
    %5 = tpu.iota {dimensions = array<i32: 1>} : vector<1x16xi32>
    %6 = tpu.concatenate %5, %5, %5, %5 in 1 : vector<1x16xi32>, vector<1x16xi32>, vector<1x16xi32>, vector<1x16xi32> -> vector<1x64xi32>
    %7 = tpu.iota {dimensions = array<i32: 0>} : vector<22x1xi32>
    %c16_i32 = arith.constant 16 : i32
    %8 = arith.muli %arg1, %c16_i32 : i32
    %9 = vector.broadcast %8 : i32 to vector<22x1xi32>
    %10 = arith.addi %9, %7 : vector<22x1xi32>
    %c3_i32 = arith.constant 3 : i32
    %11 = vector.broadcast %c3_i32 : i32 to vector<22x1xi32>
    %12 = arith.subi %10, %11 : vector<22x1xi32>
    %c0_i32 = arith.constant 0 : i32
    %13 = vector.broadcast %c0_i32 : i32 to vector<22x1xi32>
    %14 = arith.cmpi sge, %12, %13 : vector<22x1xi32>
    %c16_i32_7 = arith.constant 16 : i32
    %15 = vector.broadcast %c16_i32_7 : i32 to vector<22x1xi32>
    %16 = arith.cmpi slt, %12, %15 : vector<22x1xi32>
    %17 = arith.andi %14, %16 : vector<22x1xi1>
    %c3_i32_8 = arith.constant 3 : i32
    %18 = vector.broadcast %c3_i32_8 : i32 to vector<22x1xi32>
    %19 = arith.cmpi sge, %7, %18 : vector<22x1xi32>
    %c19_i32 = arith.constant 19 : i32
    %20 = vector.broadcast %c19_i32 : i32 to vector<22x1xi32>
    %21 = arith.cmpi slt, %7, %20 : vector<22x1xi32>
    %22 = arith.andi %19, %21 : vector<22x1xi1>
    %23 = arith.andi %17, %22 : vector<22x1xi1>
    %24 = arith.extui %23 : vector<22x1xi1> to vector<22x1xi32>
    %25 = arith.sitofp %24 : vector<22x1xi32> to vector<22x1xf32>
    %c15_i32 = arith.constant 15 : i32
    %26 = vector.broadcast %c15_i32 : i32 to vector<1x64xi32>
    %27 = arith.cmpi slt, %6, %26 : vector<1x64xi32>
    %c1_i32 = arith.constant 1 : i32
    %28 = vector.broadcast %c1_i32 : i32 to vector<1x64xi32>
    %29 = arith.cmpi sge, %6, %28 : vector<1x64xi32>
    %c14_i32 = arith.constant 14 : i32
    %30 = vector.broadcast %c14_i32 : i32 to vector<1x64xi32>
    %31 = arith.cmpi slt, %6, %30 : vector<1x64xi32>
    %c2_i32 = arith.constant 2 : i32
    %32 = vector.broadcast %c2_i32 : i32 to vector<1x64xi32>
    %33 = arith.cmpi sge, %6, %32 : vector<1x64xi32>
    %c16_i32_9 = arith.constant 16 : i32
    %34 = tpu.dynamic_rotate %1 by %c16_i32_9 dim 1 : vector<22x64xf32>, i32 -> vector<22x64xf32>
    %35 = arith.maximumf %1, %34 : vector<22x64xf32>
    %c32_i32 = arith.constant 32 : i32
    %36 = tpu.dynamic_rotate %35 by %c32_i32 dim 1 : vector<22x64xf32>, i32 -> vector<22x64xf32>
    %37 = arith.maximumf %35, %36 : vector<22x64xf32>
    %38 = arith.subf %1, %37 : vector<22x64xf32>
    %39 = math.exp %38 : vector<22x64xf32>
    %c16_i32_10 = arith.constant 16 : i32
    %40 = tpu.dynamic_rotate %39 by %c16_i32_10 dim 1 : vector<22x64xf32>, i32 -> vector<22x64xf32>
    %41 = arith.addf %39, %40 : vector<22x64xf32>
    %c32_i32_11 = arith.constant 32 : i32
    %42 = tpu.dynamic_rotate %41 by %c32_i32_11 dim 1 : vector<22x64xf32>, i32 -> vector<22x64xf32>
    %43 = arith.addf %41, %42 : vector<22x64xf32>
    %44 = tpu.concatenate %3, %3, %3, %3 in 1 : vector<22x16xi32>, vector<22x16xi32>, vector<22x16xi32>, vector<22x16xi32> -> vector<22x64xi32>
    %c16_i32_12 = arith.constant 16 : i32
    %45 = vector.broadcast %c16_i32_12 : i32 to vector<22x64xi32>
    %46 = arith.muli %44, %45 : vector<22x64xi32>
    %47 = vector.broadcast %4 : vector<1x64xi32> to vector<22x64xi32>
    %48 = arith.cmpi slt, %47, %46 : vector<22x64xi32>
    %c16_i32_13 = arith.constant 16 : i32
    %49 = vector.broadcast %c16_i32_13 : i32 to vector<22x64xi32>
    %50 = arith.addi %46, %49 : vector<22x64xi32>
    %51 = vector.broadcast %4 : vector<1x64xi32> to vector<22x64xi32>
    %52 = arith.cmpi sge, %51, %50 : vector<22x64xi32>
    %53 = arith.ori %48, %52 : vector<22x64xi1>
    %54 = vector.broadcast %17 : vector<22x1xi1> to vector<22x64xi1>
    %55 = arith.andi %53, %54 : vector<22x64xi1>
    %56 = arith.extui %55 : vector<22x64xi1> to vector<22x64xi32>
    %57 = arith.sitofp %56 : vector<22x64xi32> to vector<22x64xf32>
    %58 = arith.divf %39, %43 : vector<22x64xf32>
    %cst = arith.constant 1.000000e+00 : f32
    %59 = vector.broadcast %cst : f32 to vector<22x64xf32>
    %60 = arith.subf %59, %58 : vector<22x64xf32>
    %cst_14 = arith.constant 0.000000e+00 : f32
    %61 = vector.shape_cast %17 : vector<22x1xi1> to vector<22x1xi1>
    %62 = vector.broadcast %61 : vector<22x1xi1> to vector<22x64xi1>
    %63 = vector.broadcast %cst_14 : f32 to vector<22x64xf32>
    %64 = arith.select %62, %60, %63 : vector<22x64xi1>, vector<22x64xf32>
    %c63_i32 = arith.constant 63 : i32
    %65 = tpu.dynamic_rotate %57 by %c63_i32 dim 1 : vector<22x64xf32>, i32 -> vector<22x64xf32>
    %cst_15 = arith.constant 0.000000e+00 : f32
    %66 = vector.shape_cast %27 : vector<1x64xi1> to vector<1x64xi1>
    %67 = vector.broadcast %66 : vector<1x64xi1> to vector<22x64xi1>
    %68 = vector.broadcast %cst_15 : f32 to vector<22x64xf32>
    %69 = arith.select %67, %65, %68 : vector<22x64xi1>, vector<22x64xf32>
    %70 = arith.maximumf %57, %69 : vector<22x64xf32>
    %c1_i32_16 = arith.constant 1 : i32
    %71 = tpu.dynamic_rotate %57 by %c1_i32_16 dim 1 : vector<22x64xf32>, i32 -> vector<22x64xf32>
    %cst_17 = arith.constant 0.000000e+00 : f32
    %72 = vector.shape_cast %29 : vector<1x64xi1> to vector<1x64xi1>
    %73 = vector.broadcast %72 : vector<1x64xi1> to vector<22x64xi1>
    %74 = vector.broadcast %cst_17 : f32 to vector<22x64xf32>
    %75 = arith.select %73, %71, %74 : vector<22x64xi1>, vector<22x64xf32>
    %76 = arith.maximumf %70, %75 : vector<22x64xf32>
    %c21_i32 = arith.constant 21 : i32
    %77 = tpu.dynamic_rotate %76 by %c21_i32 dim 0 : vector<22x64xf32>, i32 -> vector<22x64xf32>
    %78 = arith.maximumf %76, %77 : vector<22x64xf32>
    %c1_i32_18 = arith.constant 1 : i32
    %79 = tpu.dynamic_rotate %76 by %c1_i32_18 dim 0 : vector<22x64xf32>, i32 -> vector<22x64xf32>
    %80 = arith.maximumf %78, %79 : vector<22x64xf32>
    %81 = arith.subf %80, %57 : vector<22x64xf32>
    %cst_19 = arith.constant 0.000000e+00 : f32
    %82 = vector.shape_cast %17 : vector<22x1xi1> to vector<22x1xi1>
    %83 = vector.broadcast %82 : vector<22x1xi1> to vector<22x64xi1>
    %84 = vector.broadcast %cst_19 : f32 to vector<22x64xf32>
    %85 = arith.select %83, %81, %84 : vector<22x64xi1>, vector<22x64xf32>
    %c63_i32_20 = arith.constant 63 : i32
    %86 = tpu.dynamic_rotate %85 by %c63_i32_20 dim 1 : vector<22x64xf32>, i32 -> vector<22x64xf32>
    %cst_21 = arith.constant 0.000000e+00 : f32
    %87 = vector.shape_cast %27 : vector<1x64xi1> to vector<1x64xi1>
    %88 = vector.broadcast %87 : vector<1x64xi1> to vector<22x64xi1>
    %89 = vector.broadcast %cst_21 : f32 to vector<22x64xf32>
    %90 = arith.select %88, %86, %89 : vector<22x64xi1>, vector<22x64xf32>
    %91 = arith.maximumf %85, %90 : vector<22x64xf32>
    %c1_i32_22 = arith.constant 1 : i32
    %92 = tpu.dynamic_rotate %85 by %c1_i32_22 dim 1 : vector<22x64xf32>, i32 -> vector<22x64xf32>
    %cst_23 = arith.constant 0.000000e+00 : f32
    %93 = vector.shape_cast %29 : vector<1x64xi1> to vector<1x64xi1>
    %94 = vector.broadcast %93 : vector<1x64xi1> to vector<22x64xi1>
    %95 = vector.broadcast %cst_23 : f32 to vector<22x64xf32>
    %96 = arith.select %94, %92, %95 : vector<22x64xi1>, vector<22x64xf32>
    %97 = arith.maximumf %91, %96 : vector<22x64xf32>
    %c62_i32 = arith.constant 62 : i32
    %98 = tpu.dynamic_rotate %85 by %c62_i32 dim 1 : vector<22x64xf32>, i32 -> vector<22x64xf32>
    %cst_24 = arith.constant 0.000000e+00 : f32
    %99 = vector.shape_cast %31 : vector<1x64xi1> to vector<1x64xi1>
    %100 = vector.broadcast %99 : vector<1x64xi1> to vector<22x64xi1>
    %101 = vector.broadcast %cst_24 : f32 to vector<22x64xf32>
    %102 = arith.select %100, %98, %101 : vector<22x64xi1>, vector<22x64xf32>
    %103 = arith.maximumf %97, %102 : vector<22x64xf32>
    %c2_i32_25 = arith.constant 2 : i32
    %104 = tpu.dynamic_rotate %85 by %c2_i32_25 dim 1 : vector<22x64xf32>, i32 -> vector<22x64xf32>
    %cst_26 = arith.constant 0.000000e+00 : f32
    %105 = vector.shape_cast %33 : vector<1x64xi1> to vector<1x64xi1>
    %106 = vector.broadcast %105 : vector<1x64xi1> to vector<22x64xi1>
    %107 = vector.broadcast %cst_26 : f32 to vector<22x64xf32>
    %108 = arith.select %106, %104, %107 : vector<22x64xi1>, vector<22x64xf32>
    %109 = arith.maximumf %103, %108 : vector<22x64xf32>
    %c21_i32_27 = arith.constant 21 : i32
    %110 = tpu.dynamic_rotate %109 by %c21_i32_27 dim 0 : vector<22x64xf32>, i32 -> vector<22x64xf32>
    %111 = arith.maximumf %109, %110 : vector<22x64xf32>
    %c1_i32_28 = arith.constant 1 : i32
    %112 = tpu.dynamic_rotate %109 by %c1_i32_28 dim 0 : vector<22x64xf32>, i32 -> vector<22x64xf32>
    %113 = arith.maximumf %111, %112 : vector<22x64xf32>
    %c20_i32 = arith.constant 20 : i32
    %114 = tpu.dynamic_rotate %109 by %c20_i32 dim 0 : vector<22x64xf32>, i32 -> vector<22x64xf32>
    %115 = arith.maximumf %113, %114 : vector<22x64xf32>
    %c2_i32_29 = arith.constant 2 : i32
    %116 = tpu.dynamic_rotate %109 by %c2_i32_29 dim 0 : vector<22x64xf32>, i32 -> vector<22x64xf32>
    %117 = arith.maximumf %115, %116 : vector<22x64xf32>
    %c63_i32_30 = arith.constant 63 : i32
    %118 = tpu.dynamic_rotate %64 by %c63_i32_30 dim 1 : vector<22x64xf32>, i32 -> vector<22x64xf32>
    %cst_31 = arith.constant 0.000000e+00 : f32
    %119 = vector.shape_cast %27 : vector<1x64xi1> to vector<1x64xi1>
    %120 = vector.broadcast %119 : vector<1x64xi1> to vector<22x64xi1>
    %121 = vector.broadcast %cst_31 : f32 to vector<22x64xf32>
    %122 = arith.select %120, %118, %121 : vector<22x64xi1>, vector<22x64xf32>
    %123 = arith.maximumf %64, %122 : vector<22x64xf32>
    %c1_i32_32 = arith.constant 1 : i32
    %124 = tpu.dynamic_rotate %64 by %c1_i32_32 dim 1 : vector<22x64xf32>, i32 -> vector<22x64xf32>
    %cst_33 = arith.constant 0.000000e+00 : f32
    %125 = vector.shape_cast %29 : vector<1x64xi1> to vector<1x64xi1>
    %126 = vector.broadcast %125 : vector<1x64xi1> to vector<22x64xi1>
    %127 = vector.broadcast %cst_33 : f32 to vector<22x64xf32>
    %128 = arith.select %126, %124, %127 : vector<22x64xi1>, vector<22x64xf32>
    %129 = arith.maximumf %123, %128 : vector<22x64xf32>
    %c21_i32_34 = arith.constant 21 : i32
    %130 = tpu.dynamic_rotate %129 by %c21_i32_34 dim 0 : vector<22x64xf32>, i32 -> vector<22x64xf32>
    %131 = arith.maximumf %129, %130 : vector<22x64xf32>
    %c1_i32_35 = arith.constant 1 : i32
    %132 = tpu.dynamic_rotate %129 by %c1_i32_35 dim 0 : vector<22x64xf32>, i32 -> vector<22x64xf32>
    %133 = arith.maximumf %131, %132 : vector<22x64xf32>
    %134 = arith.subf %133, %64 : vector<22x64xf32>
    %cst_36 = arith.constant 0.000000e+00 : f32
    %135 = vector.shape_cast %17 : vector<22x1xi1> to vector<22x1xi1>
    %136 = vector.broadcast %135 : vector<22x1xi1> to vector<22x64xi1>
    %137 = vector.broadcast %cst_36 : f32 to vector<22x64xf32>
    %138 = arith.select %136, %134, %137 : vector<22x64xi1>, vector<22x64xf32>
    %139 = vector.broadcast %25 : vector<22x1xf32> to vector<22x64xf32>
    %140 = arith.mulf %138, %139 : vector<22x64xf32>
    %141 = arith.mulf %140, %117 : vector<22x64xf32>
    %cst_37 = arith.constant dense<0.000000e+00> : vector<64xf32>
    %142 = vector.multi_reduction <add>, %141, %cst_37 [0] : vector<22x64xf32> to vector<64xf32>
    %143 = vector.shape_cast %142 : vector<64xf32> to vector<1x64xf32>
    %cst_38 = arith.constant dense<0.000000e+00> : vector<64xf32>
    %144 = vector.multi_reduction <add>, %140, %cst_38 [0] : vector<22x64xf32> to vector<64xf32>
    %145 = vector.shape_cast %144 : vector<64xf32> to vector<1x64xf32>
    %c63_i32_39 = arith.constant 63 : i32
    %146 = tpu.dynamic_rotate %138 by %c63_i32_39 dim 1 : vector<22x64xf32>, i32 -> vector<22x64xf32>
    %cst_40 = arith.constant 0.000000e+00 : f32
    %147 = vector.shape_cast %27 : vector<1x64xi1> to vector<1x64xi1>
    %148 = vector.broadcast %147 : vector<1x64xi1> to vector<22x64xi1>
    %149 = vector.broadcast %cst_40 : f32 to vector<22x64xf32>
    %150 = arith.select %148, %146, %149 : vector<22x64xi1>, vector<22x64xf32>
    %151 = arith.maximumf %138, %150 : vector<22x64xf32>
    %c1_i32_41 = arith.constant 1 : i32
    %152 = tpu.dynamic_rotate %138 by %c1_i32_41 dim 1 : vector<22x64xf32>, i32 -> vector<22x64xf32>
    %cst_42 = arith.constant 0.000000e+00 : f32
    %153 = vector.shape_cast %29 : vector<1x64xi1> to vector<1x64xi1>
    %154 = vector.broadcast %153 : vector<1x64xi1> to vector<22x64xi1>
    %155 = vector.broadcast %cst_42 : f32 to vector<22x64xf32>
    %156 = arith.select %154, %152, %155 : vector<22x64xi1>, vector<22x64xf32>
    %157 = arith.maximumf %151, %156 : vector<22x64xf32>
    %c62_i32_43 = arith.constant 62 : i32
    %158 = tpu.dynamic_rotate %138 by %c62_i32_43 dim 1 : vector<22x64xf32>, i32 -> vector<22x64xf32>
    %cst_44 = arith.constant 0.000000e+00 : f32
    %159 = vector.shape_cast %31 : vector<1x64xi1> to vector<1x64xi1>
    %160 = vector.broadcast %159 : vector<1x64xi1> to vector<22x64xi1>
    %161 = vector.broadcast %cst_44 : f32 to vector<22x64xf32>
    %162 = arith.select %160, %158, %161 : vector<22x64xi1>, vector<22x64xf32>
    %163 = arith.maximumf %157, %162 : vector<22x64xf32>
    %c2_i32_45 = arith.constant 2 : i32
    %164 = tpu.dynamic_rotate %138 by %c2_i32_45 dim 1 : vector<22x64xf32>, i32 -> vector<22x64xf32>
    %cst_46 = arith.constant 0.000000e+00 : f32
    %165 = vector.shape_cast %33 : vector<1x64xi1> to vector<1x64xi1>
    %166 = vector.broadcast %165 : vector<1x64xi1> to vector<22x64xi1>
    %167 = vector.broadcast %cst_46 : f32 to vector<22x64xf32>
    %168 = arith.select %166, %164, %167 : vector<22x64xi1>, vector<22x64xf32>
    %169 = arith.maximumf %163, %168 : vector<22x64xf32>
    %c21_i32_47 = arith.constant 21 : i32
    %170 = tpu.dynamic_rotate %169 by %c21_i32_47 dim 0 : vector<22x64xf32>, i32 -> vector<22x64xf32>
    %171 = arith.maximumf %169, %170 : vector<22x64xf32>
    %c1_i32_48 = arith.constant 1 : i32
    %172 = tpu.dynamic_rotate %169 by %c1_i32_48 dim 0 : vector<22x64xf32>, i32 -> vector<22x64xf32>
    %173 = arith.maximumf %171, %172 : vector<22x64xf32>
    %c20_i32_49 = arith.constant 20 : i32
    %174 = tpu.dynamic_rotate %169 by %c20_i32_49 dim 0 : vector<22x64xf32>, i32 -> vector<22x64xf32>
    %175 = arith.maximumf %173, %174 : vector<22x64xf32>
    %c2_i32_50 = arith.constant 2 : i32
    %176 = tpu.dynamic_rotate %169 by %c2_i32_50 dim 0 : vector<22x64xf32>, i32 -> vector<22x64xf32>
    %177 = arith.maximumf %175, %176 : vector<22x64xf32>
    %178 = vector.broadcast %25 : vector<22x1xf32> to vector<22x64xf32>
    %179 = arith.mulf %85, %178 : vector<22x64xf32>
    %180 = arith.mulf %177, %179 : vector<22x64xf32>
    %cst_51 = arith.constant dense<0.000000e+00> : vector<64xf32>
    %181 = vector.multi_reduction <add>, %180, %cst_51 [0] : vector<22x64xf32> to vector<64xf32>
    %182 = vector.shape_cast %181 : vector<64xf32> to vector<1x64xf32>
    %cst_52 = arith.constant dense<0.000000e+00> : vector<64xf32>
    %183 = vector.multi_reduction <add>, %179, %cst_52 [0] : vector<22x64xf32> to vector<64xf32>
    %184 = vector.shape_cast %183 : vector<64xf32> to vector<1x64xf32>
    %c0_53 = arith.constant 0 : index
    %c0_54 = arith.constant 0 : index
    %c0_55 = arith.constant 0 : index
    %c0_56 = arith.constant 0 : index
    %185 = vector.load %arg4[%c0_53, %c0_54, %c0_55, %c0_56] : memref<1x1x4x64xf32, #tpu.memory_space<vmem>>, vector<1x1x1x64xf32>
    %186 = vector.shape_cast %185 : vector<1x1x1x64xf32> to vector<1x64xf32>
    %187 = vector.shape_cast %143 : vector<1x64xf32> to vector<1x1x1x64xf32>
    tpu.vector_store %arg4[%c0_53, %c0_54, %c0_55, %c0_56], %187 {strides = array<i32>} : memref<1x1x4x64xf32, #tpu.memory_space<vmem>>, vector<1x1x1x64xf32>,
    %c0_57 = arith.constant 0 : index
    %c0_58 = arith.constant 0 : index
    %c1 = arith.constant 1 : index
    %c0_59 = arith.constant 0 : index
    %188 = vector.load %arg4[%c0_57, %c0_58, %c1, %c0_59] : memref<1x1x4x64xf32, #tpu.memory_space<vmem>>, vector<1x1x1x64xf32>
    %189 = vector.shape_cast %188 : vector<1x1x1x64xf32> to vector<1x64xf32>
    %190 = vector.shape_cast %145 : vector<1x64xf32> to vector<1x1x1x64xf32>
    tpu.vector_store %arg4[%c0_57, %c0_58, %c1, %c0_59], %190 {strides = array<i32>} : memref<1x1x4x64xf32, #tpu.memory_space<vmem>>, vector<1x1x1x64xf32>,
    %c0_60 = arith.constant 0 : index
    %c0_61 = arith.constant 0 : index
    %c2 = arith.constant 2 : index
    %c0_62 = arith.constant 0 : index
    %191 = vector.load %arg4[%c0_60, %c0_61, %c2, %c0_62] : memref<1x1x4x64xf32, #tpu.memory_space<vmem>>, vector<1x1x1x64xf32>
    %192 = vector.shape_cast %191 : vector<1x1x1x64xf32> to vector<1x64xf32>
    %193 = vector.shape_cast %182 : vector<1x64xf32> to vector<1x1x1x64xf32>
    tpu.vector_store %arg4[%c0_60, %c0_61, %c2, %c0_62], %193 {strides = array<i32>} : memref<1x1x4x64xf32, #tpu.memory_space<vmem>>, vector<1x1x1x64xf32>,
    %c0_63 = arith.constant 0 : index
    %c0_64 = arith.constant 0 : index
    %c3 = arith.constant 3 : index
    %c0_65 = arith.constant 0 : index
    %194 = vector.load %arg4[%c0_63, %c0_64, %c3, %c0_65] : memref<1x1x4x64xf32, #tpu.memory_space<vmem>>, vector<1x1x1x64xf32>
    %195 = vector.shape_cast %194 : vector<1x1x1x64xf32> to vector<1x64xf32>
    %196 = vector.shape_cast %184 : vector<1x64xf32> to vector<1x1x1x64xf32>
    tpu.vector_store %arg4[%c0_63, %c0_64, %c3, %c0_65], %196 {strides = array<i32>} : memref<1x1x4x64xf32, #tpu.memory_space<vmem>>, vector<1x1x1x64xf32>,
    return
  }
  func.func @transform_0(%arg0: i32, %arg1: i32) -> (i32, i32, i32, i32) {
    %c0_i32 = arith.constant 0 : i32
    %c0_i32_0 = arith.constant 0 : i32
    %c0_i32_1 = arith.constant 0 : i32
    return %arg0, %arg1, %c0_i32, %c0_i32_0 : i32, i32, i32, i32
  }
  func.func @transform_1(%arg0: i32, %arg1: i32) -> (i32, i32, i32, i32) {
    %c0_i32 = arith.constant 0 : i32
    %c0_i32_0 = arith.constant 0 : i32
    %c0_i32_1 = arith.constant 0 : i32
    return %arg0, %arg1, %c0_i32, %c0_i32_0 : i32, i32, i32, i32
  }
  func.func @transform_2(%arg0: i32, %arg1: i32) -> (i32, i32, i32, i32) {
    %c0_i32 = arith.constant 0 : i32
    %c0_i32_0 = arith.constant 0 : i32
    %c0_i32_1 = arith.constant 0 : i32
    return %arg0, %arg1, %c0_i32, %c0_i32_0 : i32, i32, i32, i32
  }
}

</mosaic_0001>

<bundles_post_ra>
// kernel: tpu_custom_call.1
= control target key start
LH: loop header
LB: loop body
LE: loop exit
PB: predicated region body
PF: predicated region fallthrough
CT: control target
= control target key end

     0   :  { %7 = vsyncpa [#allocation3], 0  ;;  %s2063_s0 = inlined_call_operand.vmem [shape: f32[2,1,22,64], index: 0, kind: input, shape index: {}]   ;;  %s2064_s1 = inlined_call_operand.vmem [shape: s32[2,1,22,16], index: 1, kind: input, shape index: {}]   ;;  %s2065_s2 = inlined_call_operand.hbm [shape: f32[2,1,4,64], index: 2, kind: output, shape index: {}]  }
   0x1   :  { %9 = vsyncpa [#allocation3 + $0x1], 0  ;;  %s1379_s9 = smov 0   ;;  %s1381_s10 = smov 0  }
   0x2   :  { %s1383_s11 = smov 0   ;;  %s1385_s12 = smov 0  }
   0x3   :  { %s1387_s13 = smov 0   ;;  %s1389_s14 = smov 0  }
   0x4 LB: > { %s1151_s15 = sadd.s32 4294967295, %s1349_s14   ;;  %s1152_s16 = sadd.s32 4294967294, %s1349_s14   ;;  %s1349_s14 = sphi %s1389_s14, %s15_s14   ;;  %s1345_s13 = sphi %s1387_s13, %s2080_s13   ;;  %s1341_s12 = sphi %s1385_s12, %s2079_s12   ;;  %s1337_s11 = sphi %s1383_s11, %s2078_s11   ;;  %s1333_s10 = sphi %s1381_s10, %s2077_s10   ;;  %s1329_s9 = sphi %s1379_s9, %s2076_s9  }
   0x5   : > { %s27_s17 = sadd.s32 1, %s1345_s13  ;;  %s92_s18 = sadd.s32 1, %s1337_s11 }
   0x6   : > { %p29_p0 = scmp.ge.s32.totalorder %s27_s17, 2  ;;  %p102_p1 = scmp.ne.s32.totalorder %s1337_s11, %s1333_s10 }
   0x7   : > { %p103_p2 = scmp.eq.s32.totalorder %s1151_s15, 1  ;;  %p108_p3 = scmp.ne.s32.totalorder %s1333_s10, %s1329_s9 }
   0x8   : > { %s2082_s17 = smov (%p29_p0, %s27_s17), 0  ;;  %p109_p5 = scmp.eq.s32.totalorder %s1152_s16, 1 }
   0x9   : > { %p1419_p4 = por %p103_p2, %p102_p1  ;;  %s87_s20 = ssub.s32 %s1345_s13, %s2082_s17 }
   0xa   : > { %p1155_p6 = scmp.ge.s32.totalorder %s1349_s14, 1  ;;  %p90_p7 = scmp.eq.s32.totalorder %s87_s20, 0 }
   0xb   : > { %p1426_p8 = por %p109_p5, %p108_p3  ;;  %p151_p9 = scmp.lt.s32.totalorder %s1349_s14, 3 }
   0xc   : > { %s1432_s22 = scalar_select %p90_p7, %s1337_s11, %s92_s18  }
   0xd   : > { %p152_p10 = pnand %p1155_p6, %p151_p9 }
   0xe   : > { %p186_p11 = scmp.lt.s32.totalorder (!%p152_p10), %s1341_s12, 1  ;;  %s1351_s28 = smov (!%p152_p10), 64   ;;  %vm267_vm0 = vcmask (!%p152_p10), 1048064   ;;  %vm218_vm1 = vcmask (!%p152_p10), 130048   ;;  %vm220_vm2 = vcmask (!%p152_p10), 261120   ;;  %vm222_vm3 = vcmask (!%p152_p10), 392192  }
   0xf   : > { %155 = sbr.rel (%p152_p10) target bundleno = 2295 (0x8f7), region = 28  ;;  %s1352_s29 = smov (!%p152_p10), 80  }
  0x10   : > { %s1353_s30 = smov (!%p152_p10), 96   ;;  %s1354_s6 = smov (!%p152_p10), 16  }
  0x11   : > { %s1355_s7 = smov (!%p152_p10), 32   ;;  %s1356_s8 = smov (!%p152_p10), 48  }
  0x12   : > { %s1358_s15 = smov (!%p152_p10), 127   ;;  %s1359_s16 = smov (!%p152_p10), 65  }
  0x13   : > { %s183_s18 = sand.u32 (!%p152_p10), 1, %s1333_s10   ;;  %s1362_s25 = smov (!%p152_p10), 66  }
  0x14   : > { %s1156_s20 = sshll.u32 (!%p152_p10), %s183_s18, 2  ;;  %s1168_s26 = sshll.u32 (!%p152_p10), %s1341_s12, 6 }
  0x15   : > { %s1039_s3 = scalar_lea.sflag (!%p152_p10), [#allocation3], %s183_s18 }
  0x16   : > { %s1436_s23 = scalar_select %p186_p11, %s1341_s12, 1 }
  0x17   : > { %s1363_s12 = smov [#allocation2]  }
  0x18   : > { %s1171_s24 = smul.u32 24, %s1436_s23  ;;  %s1811_s23 = scalar_lea.vmem [#allocation2], %s1156_s20 }
  0x1a   : > { %s194_s27 = scalar_lea.vmem %s2063_s0, %s1171_s24  ;;  %s203_s5 = scalar_lea.vmem %s2064_s1, %s1171_s24 }
  0x1b   : > { %v204_v0 = vld [vmem:[%s194_s27] sm:$0xff]  ;;  %v1444_v1 = vld [vmem:[%s194_s27 + $0x10] sm:$0x3f]  ;;  %v205_v2 = vld [vmem:[%s194_s27 + $0x8] sm:$0xff]  ;;  %s1361_s24 = smov 126   ;;  %s1053_s27 = sshll.u32 %s1811_s23, 4  ;;  %s2014_s27 = int_to_ptr.vmem [resolvable:$true] %s1053_s27 }
  0x1c   : > { %268 = vrot.lane.b32.xlu0 %v204_v0, %s1351_s28  ;;  %274 = vrot.lane.b32.xlu1 %v1444_v1, %s1351_s28  ;;  %s1271_s4 = scalar_lea.vmem %s2014_s27, 64 }
  0x1d   : > { %p1272_p12 = scmp.ne.s32.totalorder %s2014_s27, %s1271_s4 }
  0x1f   : > { %p1273_p13 = pnand %p1272_p12, %p1419_p4 }
  0x20   : > { %271 = vrot.lane.b32.xlu0 %v205_v2, %s1351_s28 }
  0x21   : > { %p1274_p0 = pneg %p1273_p13 }
  0x8e   : > { %v269_v3 = vpop.permute.xlu0 %268  ;;  %v275_v4 = vpop.permute.xlu1 %274 }
  0x8f   : > { %v270_v5 = vsel %vm267_vm0, %v269_v3, %v204_v0  ;;  %v276_v6 = vsel %vm267_vm0, %v275_v4, %v1444_v1 }
  0x90   : > { %277 = vrot.lane.b32.xlu1 %v270_v5, %s1351_s28 }
  0x92   : > { %v272_v7 = vpop.permute.xlu0 %271 }
  0x93   : > { %v273_v8 = vsel %vm267_vm0, %v272_v7, %v205_v2 }
  0x94   : > { %281 = vrot.lane.b32.xlu1 %v276_v6, %s1351_s28  ;;  %279 = vrot.lane.b32.xlu0 %v273_v8, %s1351_s28  ;;  %v207_v8 = vld [vmem:[%s203_s5] sm:$0xff] }
 0x102   : > { %v278_v9 = vpop.permute.xlu1 %277 }
 0x103   : > { %v283_v10 = vsel %vm267_vm0, %v278_v9, %v204_v0  ;;  %v208_v9 = vld [vmem:[%s203_s5 + $0x8] sm:$0xff] }
 0x104   : > { %289 = vrot.lane.b32.xlu0 %v283_v10, %s1352_s29 }
 0x106   : > { %v282_v11 = vpop.permute.xlu1 %281  ;;  %v280_v12 = vpop.permute.xlu0 %279 }
 0x107   : > { %v285_v13 = vsel %vm267_vm0, %v282_v11, %v1444_v1  ;;  %v284_v14 = vsel %vm267_vm0, %v280_v12, %v205_v2 }
 0x108   : > { %293 = vrot.lane.b32.xlu0 %v285_v13, %s1352_s29  ;;  %291 = vrot.lane.b32.xlu1 %v284_v14, %s1352_s29 }
 0x176   : > { %v290_v15 = vpop.permute.xlu0 %289 }
 0x177   : > { %v298_v16 = vmax.f32 %v204_v0, %v290_v15 }
 0x179   : > { %301 = vrot.lane.b32.xlu1 %v298_v16, %s1351_s28 }
 0x17a   : > { %v292_v17 = vpop.permute.xlu1 %291  ;;  %v294_v18 = vpop.permute.xlu0 %293 }
 0x17b   : > { %v299_v19 = vmax.f32 %v205_v2, %v292_v17  ;;  %v300_v20 = vmax.f32 %v1444_v1, %v294_v18 }
 0x17d   : > { %304 = vrot.lane.b32.xlu0 %v299_v19, %s1351_s28  ;;  %307 = vrot.lane.b32.xlu1 %v300_v20, %s1351_s28 }
 0x1eb   : > { %v302_v21 = vpop.permute.xlu1 %301 }
 0x1ec   : > { %v303_v22 = vsel %vm267_vm0, %v302_v21, %v298_v16 }
 0x1ed   : > { %310 = vrot.lane.b32.xlu0 %v303_v22, %s1351_s28 }
 0x1ef   : > { %v308_v23 = vpop.permute.xlu1 %307  ;;  %v305_v24 = vpop.permute.xlu0 %304 }
 0x1f0   : > { %v309_v25 = vsel %vm267_vm0, %v308_v23, %v300_v20  ;;  %v306_v26 = vsel %vm267_vm0, %v305_v24, %v299_v19  ;;  %v210_v24 = vlaneseq }
 0x1f1   : > { %314 = vrot.lane.b32.xlu0 %v309_v25, %s1351_s28  ;;  %312 = vrot.lane.b32.xlu1 %v306_v26, %s1351_s28 }
 0x25f   : > { %v311_v27 = vpop.permute.xlu0 %310 }
 0x260   : > { %v316_v28 = vsel %vm267_vm0, %v311_v27, %v298_v16 }
 0x261   : > { %322 = vrot.lane.b32.xlu1 %v316_v28, %s1353_s30 }
 0x263   : > { %v313_v29 = vpop.permute.xlu1 %312  ;;  %v315_v30 = vpop.permute.xlu0 %314 }
 0x264   : > { %v317_v31 = vsel %vm267_vm0, %v313_v29, %v299_v19  ;;  %v318_v32 = vsel %vm267_vm0, %v315_v30, %v300_v20  ;;  %v1545_v30 = vshrl.u32 %v210_v24, 7 }
 0x265   : > { %324 = vrot.lane.b32.xlu0 %v317_v31, %s1353_s30  ;;  %326 = vrot.lane.b32.xlu1 %v318_v32, %s1353_s30 }
 0x2d3   : > { %v323_v33 = vpop.permute.xlu1 %322 }
 0x2d4   : > { %v331_v34 = vmax.f32 %v298_v16, %v323_v33  ;;  %v209_v16 = vld [vmem:[%s203_s5 + $0x10] sm:$0x3f]  ;;  %s1275_s5 = sshll.u32 %s1363_s12, 4  ;;  %s1276_s5 = int_to_ptr.vmem [resolvable:$false] %s1275_s5 }
 0x2d5   : > { %p1278_p1 = scmp.lt.s32.totalorder %s2014_s27, %s1276_s5 }
 0x2d6   : > { %v334_v35 = vsub.f32 %v204_v0, %v331_v34 }
 0x2d7   : > { %v327_v36 = vpop.permute.xlu1 %326  ;;  %v325_v37 = vpop.permute.xlu0 %324 }
 0x2d8   : > { %v337_v38 = vmul.f32 1.442695, %v334_v35  ;;  %v333_v39 = vmax.f32 %v300_v20, %v327_v36  ;;  %v332_v40 = vmax.f32 %v299_v19, %v325_v37  ;;  %v1548_v36 = vand.u32 127, %v210_v24 }
 0x2d9   : > { %v1551_v37 = vadd.s32 4294967293, %v1545_v30 }
 0x2da   : > { %1259 = vpow2.f32 %v337_v38  ;;  %v336_v41 = vsub.f32 %v1444_v1, %v333_v39  ;;  %v335_v42 = vsub.f32 %v205_v2, %v332_v40 }
 0x2db   : > { %vm236_vm5 = vcmp.ge.s32.totalorder %v1551_v37, 0 }
 0x2dc   : > { %v341_v43 = vmul.f32 1.442695, %v336_v41  ;;  %v339_v44 = vmul.f32 1.442695, %v335_v42 }
 0x2de   : > { %1261 = vpow2.f32 %v341_v43 }
 0x2df   : > { %1263 = vpow2.f32 %v339_v44 }
 0x2e4   : > { %v1481_v45 = vpop.eup %1259 }
 0x2e5   : > { %343 = vrot.lane.b32.xlu0 %v1481_v45, %s1351_s28 }
 0x2e8   : > { %v1485_v46 = vpop.eup %1261 }
 0x2e9   : > { %v1487_v47 = vpop.eup %1263  ;;  %349 = vrot.lane.b32.xlu0 %v1485_v46, %s1351_s28 }
 0x2ea   : > { %346 = vrot.lane.b32.xlu1 %v1487_v47, %s1351_s28 }
 0x357   : > { %v344_v48 = vpop.permute.xlu0 %343 }
 0x358   : > { %v345_v49 = vsel %vm267_vm0, %v344_v48, %v1481_v45  ;;  %v1559_v48 = vadd.s32 16, %v1545_v30 }
 0x359   : > { %352 = vrot.lane.b32.xlu1 %v345_v49, %s1351_s28 }
 0x35b   : > { %v350_v50 = vpop.permute.xlu0 %349 }
 0x35c   : > { %v347_v51 = vpop.permute.xlu1 %346  ;;  %v351_v52 = vsel %vm267_vm0, %v350_v50, %v1485_v46 }
 0x35d   : > { %v348_v53 = vsel %vm267_vm0, %v347_v51, %v1487_v47  ;;  %356 = vrot.lane.b32.xlu1 %v351_v52, %s1351_s28 }
 0x35e   : > { %354 = vrot.lane.b32.xlu0 %v348_v53, %s1351_s28 }
 0x3cb   : > { %v353_v54 = vpop.permute.xlu1 %352 }
 0x3cc   : > { %v358_v55 = vsel %vm267_vm0, %v353_v54, %v1481_v45 }
 0x3cd   : > { %364 = vrot.lane.b32.xlu0 %v358_v55, %s1352_s29 }
 0x3cf   : > { %v357_v56 = vpop.permute.xlu1 %356 }
 0x3d0   : > { %v355_v57 = vpop.permute.xlu0 %354  ;;  %v360_v58 = vsel %vm267_vm0, %v357_v56, %v1485_v46 }
 0x3d1   : > { %368 = vrot.lane.b32.xlu0 %v360_v58, %s1352_s29  ;;  %v359_v59 = vsel %vm267_vm0, %v355_v57, %v1487_v47  ;;  %v1573_v57 = vadd.s32 4294967293, %v1559_v48 }
 0x3d2   : > { %366 = vrot.lane.b32.xlu1 %v359_v59, %s1352_s29 }
 0x3d3   : > { %vm241_vm14 = vcmp.lt.s32.totalorder %v1573_v57, 16 }
 0x43f   : > { %v365_v60 = vpop.permute.xlu0 %364 }
 0x440   : > { %v373_v61 = vadd.f32 %v1481_v45, %v365_v60 }
 0x442   : > { %376 = vrot.lane.b32.xlu1 %v373_v61, %s1351_s28 }
 0x443   : > { %v369_v62 = vpop.permute.xlu0 %368 }
 0x444   : > { %v367_v63 = vpop.permute.xlu1 %366  ;;  %v375_v0 = vadd.f32 %v1485_v46, %v369_v62 }
 0x445   : > { %v374_v1 = vadd.f32 %v1487_v47, %v367_v63 }
 0x446   : > { %382 = vrot.lane.b32.xlu1 %v375_v0, %s1351_s28 }
 0x447   : > { %379 = vrot.lane.b32.xlu0 %v374_v1, %s1351_s28 }
 0x4b4   : > { %v377_v2 = vpop.permute.xlu1 %376 }
 0x4b5   : > { %v378_v3 = vsel %vm267_vm0, %v377_v2, %v373_v61 }
 0x4b6   : > { %385 = vrot.lane.b32.xlu0 %v378_v3, %s1351_s28 }
 0x4b8   : > { %v383_v4 = vpop.permute.xlu1 %382 }
 0x4b9   : > { %v380_v5 = vpop.permute.xlu0 %379  ;;  %v384_v6 = vsel %vm267_vm0, %v383_v4, %v375_v0 }
 0x4ba   : > { %389 = vrot.lane.b32.xlu0 %v384_v6, %s1351_s28  ;;  %v381_v7 = vsel %vm267_vm0, %v380_v5, %v374_v1 }
 0x4bb   : > { %387 = vrot.lane.b32.xlu1 %v381_v7, %s1351_s28 }
 0x4be   : > { %409 = vrot.lane.b32.xlu0 %v207_v8, %s1354_s6 }
 0x4bf   : > { %415 = vrot.lane.b32.xlu1 %v207_v8, %s1355_s7 }
 0x4c2   : > { %411 = vrot.lane.b32.xlu0 %v208_v9, %s1354_s6 }
 0x528   : > { %v386_v10 = vpop.permute.xlu0 %385 }
 0x529   : > { %v391_v11 = vsel %vm267_vm0, %v386_v10, %v373_v61 }
 0x52a   : > { %397 = vrot.lane.b32.xlu1 %v391_v11, %s1353_s30 }
 0x52c   : > { %v390_v12 = vpop.permute.xlu0 %389 }
 0x52d   : > { %v388_v13 = vpop.permute.xlu1 %387  ;;  %v393_v14 = vsel %vm267_vm0, %v390_v12, %v375_v0 }
 0x52e   : > { %v392_v15 = vsel %vm267_vm0, %v388_v13, %v374_v1  ;;  %401 = vrot.lane.b32.xlu1 %v393_v14, %s1353_s30 }
 0x52f   : > { %399 = vrot.lane.b32.xlu0 %v392_v15, %s1353_s30  ;;  %s2012_s30 = scalar_lea.hbm %s2065_s2, %s1168_s26 }
 0x530   : > { %v410_v17 = vpop.permute.xlu0 %409 }
 0x531   : > { %v416_v18 = vpop.permute.xlu1 %415  ;;  %v427_v25 = vsel %vm218_vm1, %v207_v8, %v410_v17 }
 0x532   : > { %413 = vrot.lane.b32.xlu1 %v209_v16, %s1354_s6  ;;  %v430_v28 = vsel %vm220_vm2, %v427_v25, %v416_v18 }
 0x533   : > { %421 = vrot.lane.b32.xlu0 %v207_v8, %s1356_s8 }
 0x534   : > { %v412_v19 = vpop.permute.xlu0 %411 }
 0x535   : > { %v428_v41 = vsel %vm218_vm1, %v208_v9, %v412_v19 }
 0x536   : > { %417 = vrot.lane.b32.xlu1 %v208_v9, %s1355_s7 }
 0x537   : > { %419 = vrot.lane.b32.xlu0 %v209_v16, %s1355_s7 }
 0x53a   : > { %423 = vrot.lane.b32.xlu1 %v208_v9, %s1356_s8 }
 0x53b   : > { %425 = vrot.lane.b32.xlu0 %v209_v16, %s1356_s8 }
 0x59c   : > { %v398_v20 = vpop.permute.xlu1 %397 }
 0x59d   : > { %v406_v21 = vadd.f32 %v398_v20, %v373_v61  ;;  %v1357_v61 = vmov 0.0  }
 0x59f   : > { %1265 = vrcp.f32 %v406_v21 }
 0x5a0   : > { %v402_v22 = vpop.permute.xlu1 %401 }
 0x5a1   : > { %v400_v23 = vpop.permute.xlu0 %399  ;;  %v408_v29 = vadd.f32 %v402_v22, %v375_v0 }
 0x5a2   : > { %v407_v26 = vadd.f32 %v400_v23, %v374_v1 }
 0x5a4   : > { %v414_v27 = vpop.permute.xlu1 %413  ;;  %1267 = vrcp.f32 %v407_v26 }
 0x5a5   : > { %v422_v31 = vpop.permute.xlu0 %421  ;;  %1269 = vrcp.f32 %v408_v29  ;;  %v429_v42 = vsel %vm218_vm1, %v209_v16, %v414_v27 }
 0x5a6   : > { %v433_v32 = vsel %vm222_vm3, %v430_v28, %v422_v31 }
 0x5a7   : > { %v436_v33 = vmul.u32 16, %v433_v32 }
 0x5a8   : > { %v418_v34 = vpop.permute.xlu1 %417 }
 0x5a9   : > { %v1266_v35 = vpop.eup %1265  ;;  %v442_v38 = vadd.s32 16, %v436_v33  ;;  %v420_v39 = vpop.permute.xlu0 %419  ;;  %v431_v43 = vsel %vm220_vm2, %v428_v41, %v418_v34  ;;  %vm439_vm6 = vcmp.lt.s32.totalorder %v1548_v36, %v436_v33 }
 0x5aa   : > { %v467_v40 = vmul.f32 %v1266_v35, %v1481_v45  ;;  %v432_v50 = vsel %vm220_vm2, %v429_v42, %v420_v39  ;;  %v1657_v42 = vsub.s32 0, %v1545_v30 }
 0x5ab   : > { %vm445_vm4 = vcmp.ge.s32.totalorder %v1548_v36, %v442_v38 }
 0x5ac   : > { %v424_v44 = vpop.permute.xlu1 %423  ;;  %v472_v49 = vsub.f32 1.0, %v467_v40  ;;  %vm448_vm7 = vmor %vm439_vm6, %vm445_vm4 }
 0x5ad   : > { %v434_v45 = vsel %vm222_vm3, %v431_v43, %v424_v44  ;;  %v426_v51 = vpop.permute.xlu0 %425  ;;  %vm457_vm8 = vmand %vm448_vm7, %vm236_vm5  ;;  %v1360_v43 = vmov 0  }
 0x5ae   : > { %v437_v52 = vmul.u32 16, %v434_v45  ;;  %v435_v53 = vsel %vm222_vm3, %v432_v50, %v426_v51  ;;  %v1568_v54 = vsel %vm236_vm5, %v472_v49, 0.0  ;;  %v1268_v59 = vpop.eup %1267  ;;  %v1582_v62 = vsel %vm457_vm8, 1.0, %v1357_v61 }
 0x5af   : > { %v438_v55 = vmul.u32 16, %v435_v53  ;;  %741 = vrot.lane.b32.xlu0 %v1568_v54, %s1351_s28  ;;  %v1270_v60 = vpop.eup %1269  ;;  %v469_v0 = vmul.f32 %v1268_v59, %v1487_v47 }
 0x5b0   : > { %v443_v56 = vadd.s32 16, %v437_v52  ;;  %vm440_vm9 = vcmp.lt.s32.totalorder %v1548_v36, %v437_v52  ;;  %v471_v3 = vmul.f32 %v1270_v60, %v1485_v46 }
 0x5b1   : > { %v444_v58 = vadd.s32 16, %v438_v55  ;;  %vm441_vm12 = vcmp.lt.s32.totalorder %v1548_v36, %v438_v55  ;;  %v1600_v4 = vsub.f32 1.0, %v469_v0 }
 0x5b2   : > { %vm446_vm10 = vcmp.ge.s32.totalorder %v1548_v36, %v443_v56  ;;  %v474_v5 = vsub.f32 1.0, %v471_v3 }
 0x5b3   : > { %vm449_vm11 = vmor %vm440_vm9, %vm446_vm10  ;;  %vm447_vm13 = vcmp.ge.s32.totalorder %v1548_v36, %v444_v58  ;;  %vm245_vm9 = vcmp.ge.s32.totalorder %v1545_v30, 3  ;;  %vm541_vm10 = vcmask 1047558  }
 0x5b4   : > { %v1585_v63 = vsel %vm449_vm11, 1.0, %v1357_v61  ;;  %vm450_vm15 = vmor %vm441_vm12, %vm447_vm13  ;;  %v1606_v47 = vsel %vm241_vm14, %v474_v5, 0.0  ;;  %vm547_vm11 = vcmask 1046528   ;;  %vm566_vm12 = vcmask 1042432  }
 0x5b5   : > { %vm459_vm4 = vmand %vm450_vm15, %vm241_vm14  ;;  %v1239_v1 = vpack.i.bf16 %v1585_v63, %v1582_v62  ;;  %vm250_vm15 = vcmp.lt.s32.totalorder %v1559_v48, 19 }
 0x5b6   : > { %v1594_v2 = vsel %vm459_vm4, 1.0, %v1357_v61  ;;  %vm254_vm13 = vmand %vm236_vm5, %vm245_vm9  ;;  %vm840_vm4 = vcmask 523264  }
 0x5b7   : > { %484 = vrot.lane.b32.xlu0 %v1594_v2, %s1351_s28  ;;  %1240 = vrot.lane.b32.xlu1 %v1239_v1, %s1351_s28 }
 0x5bb   : > { %744 = vrot.lane.b32.xlu1 %v1600_v4, %s1351_s28 }
 0x5bf   : > { %747 = vrot.lane.b32.xlu1 %v1606_v47, %s1351_s28 }
 0x621   : > { %v742_v6 = vpop.permute.xlu0 %741 }
 0x622   : > { %v743_v46 = vsel %vm267_vm0, %v742_v6, %v1568_v54 }
 0x623   : > { %750 = vrot.lane.b32.xlu1 %v743_v46, %s1351_s28 }
 0x629   : > { %v485_v7 = vpop.permute.xlu0 %484  ;;  %v1241_v8 = vpop.permute.xlu1 %1240 }
 0x62a   : > { %v1243_v9 = vunpack.i.h.bf16 %v1241_v8  ;;  %v1242_v10 = vunpack.i.l.bf16 %v1241_v8  ;;  %v486_v11 = vsel %vm267_vm0, %v485_v7, %v1594_v2 }
 0x62b   : > { %491 = vrot.lane.b32.xlu1 %v486_v11, %s1351_s28 }
 0x62c   : > { %v480_v12 = vsel %vm267_vm0, %v1242_v10, %v1582_v62  ;;  %v483_v13 = vsel %vm267_vm0, %v1243_v9, %v1585_v63 }
 0x62d   : > { %v745_v14 = vpop.permute.xlu1 %744  ;;  %v1244_v15 = vpack.i.bf16 %v483_v13, %v480_v12 }
 0x62e   : > { %v746_v16 = vsel %vm267_vm0, %v745_v14, %v1600_v4 }
 0x62f   : > { %1245 = vrot.lane.b32.xlu0 %v1244_v15, %s1351_s28  ;;  %212 = vrot.lane.b32.xlu1 %v1548_v36, %s1354_s6  ;;  %s1277_s6 = scalar_lea.vmem %s1276_s5, 128 }
 0x630   : > { %p1279_p2 = scmp.lt.s32.totalorder %s1277_s6, %s1271_s4 }
 0x631   : > { %v748_v17 = vpop.permute.xlu1 %747 }
 0x632   : > { %v749_v18 = vsel %vm267_vm0, %v748_v17, %v1606_v47  ;;  %p1280_p3 = por %p1279_p2, %p1278_p1 }
 0x633   : > { %752 = vrot.lane.b32.xlu0 %v746_v16, %s1351_s28  ;;  %216 = vrot.lane.b32.xlu1 %v1548_v36, %s1356_s8 }
 0x634   : > { %p1281_p5 = pnand %p1280_p3, %p1274_p0 }
 0x637   : > { %754 = vrot.lane.b32.xlu0 %v749_v18, %s1351_s28 }
 0x63b   : > { %214 = vrot.lane.b32.xlu0 %v1548_v36, %s1355_s7 }
 0x695   : > { %v751_v19 = vpop.permute.xlu1 %750 }
 0x696   : > { %v756_v33 = vsel %vm267_vm0, %v751_v19, %v1568_v54 }
 0x69d   : > { %v492_v20 = vpop.permute.xlu1 %491 }
 0x69e   : > { %v495_v21 = vsel %vm267_vm0, %v492_v20, %v1594_v2 }
 0x69f   : > { %509 = vrot.lane.b32.xlu1 %v495_v21, %s1358_s15 }
 0x6a1   : > { %v1246_v22 = vpop.permute.xlu0 %1245  ;;  %v213_v31 = vpop.permute.xlu1 %212 }
 0x6a2   : > { %v1248_v23 = vunpack.i.h.bf16 %v1246_v22  ;;  %v1247_v24 = vunpack.i.l.bf16 %v1246_v22  ;;  %v219_v34 = vsel %vm218_vm1, %v1548_v36, %v213_v31 }
 0x6a4   : > { %v493_v25 = vsel %vm267_vm0, %v1247_v24, %v1582_v62  ;;  %v494_v26 = vsel %vm267_vm0, %v1248_v23, %v1585_v63 }
 0x6a5   : > { %v753_v27 = vpop.permute.xlu0 %752  ;;  %v1249_v28 = vpack.i.bf16 %v494_v26, %v493_v25  ;;  %v217_v35 = vpop.permute.xlu1 %216 }
 0x6a6   : > { %v757_v29 = vsel %vm267_vm0, %v753_v27, %v1600_v4 }
 0x6a7   : > { %779 = vrot.lane.b32.xlu1 %v757_v29, %s1359_s16  ;;  %1250 = vrot.lane.b32.xlu0 %v1249_v28, %s1358_s15 }
 0x6a9   : > { %v755_v32 = vpop.permute.xlu0 %754 }
 0x6aa   : > { %v758_v39 = vsel %vm267_vm0, %v755_v32, %v1606_v47 }
 0x6ab   : > { %762 = vrot.lane.b32.xlu1 %v756_v33, %s1358_s15  ;;  %1255 = vrot.lane.b32.xlu0 %v1249_v28, %s1359_s16 }
 0x6ad   : > { %v215_v38 = vpop.permute.xlu0 %214 }
 0x6ae   : > { %v221_v40 = vsel %vm220_vm2, %v219_v34, %v215_v38 }
 0x6af   : > { %766 = vrot.lane.b32.xlu1 %v758_v39, %s1358_s15  ;;  %764 = vrot.lane.b32.xlu0 %v757_v29, %s1358_s15  ;;  %v223_v41 = vsel %vm222_vm3, %v221_v40, %v217_v35 }
 0x6b0   : > { %vm265_vm6 = vcmp.lt.s32.totalorder %v223_v41, 14  ;;  %vm266_vm7 = vcmp.ge.s32.totalorder %v223_v41, 2  ;;  %vm263_vm1 = vcmp.lt.s32.totalorder %v223_v41, 15  ;;  %vm264_vm2 = vcmp.ge.s32.totalorder %v223_v41, 1 }
 0x6b1   : > { %v1659_v36 = vsel %vm265_vm6, 1, %v1360_v43  ;;  %v1661_v44 = vsel %vm266_vm7, 1, %v1360_v43  ;;  %v496_v51 = vsel %vm263_vm1, 1, %v1360_v43  ;;  %v520_v52 = vsel %vm264_vm2, 1, %v1360_v43  ;;  %vm256_vm6 = vmand %vm241_vm14, %vm250_vm15 }
 0x6b2   : > { %v641_v49 = vrot.slane %v1659_v36, %v1657_v42  ;;  %v662_v50 = vrot.slane %v1661_v44, %v1657_v42  ;;  %v500_v53 = vrot.slane %v496_v51, %v1657_v42  ;;  %v524_v60 = vrot.slane %v520_v52, %v1657_v42 }
 0x6b3   : > { %781 = vrot.lane.b32.xlu1 %v758_v39, %s1359_s16  ;;  %777 = vrot.lane.b32.xlu0 %v756_v33, %s1359_s16  ;;  %vm844_vm7 = vcmask 521216   ;;  %vm715_vm1 = vcmask 1045504   ;;  %vm727_vm2 = vcmask 1043456  }
 0x6b4   : > { %vm1672_vm3 = vcmp.eq.s32.totalorder %v500_v53, 1  ;;  %vm1680_vm8 = vcmp.eq.s32.totalorder %v524_v60, 1 }
 0x6b7   : > { %530 = vrot.lane.b32.xlu0 %v495_v21, %s1359_s16 }
 0x711   : > { %v510_v45 = vpop.permute.xlu1 %509 }
 0x712   : > { %v516_v21 = vsel %vm1672_vm3, %v510_v45, 0.0 }
 0x713   : > { %v519_v33 = vmax.f32 %v1594_v2, %v516_v21 }
 0x719   : > { %v780_v55 = vpop.permute.xlu1 %779  ;;  %v1251_v56 = vpop.permute.xlu0 %1250 }
 0x71a   : > { %v1253_v58 = vunpack.i.h.bf16 %v1251_v56  ;;  %v1252_v59 = vunpack.i.l.bf16 %v1251_v56  ;;  %v787_v22 = vsel %vm1680_vm8, %v780_v55, 0.0  ;;  %v1162_v55 = vsel %vm254_vm13, 1.0, %v1357_v61 }
 0x71c   : > { %v515_v5 = vsel %vm1672_vm3, %v1253_v58, 0.0  ;;  %v514_v6 = vsel %vm1672_vm3, %v1252_v59, 0.0 }
 0x71d   : > { %v763_v1 = vpop.permute.xlu1 %762  ;;  %v1256_v3 = vpop.permute.xlu0 %1255  ;;  %v518_v11 = vmax.f32 %v1585_v63, %v515_v5  ;;  %v517_v12 = vmax.f32 %v1582_v62, %v514_v6 }
 0x71e   : > { %v1258_v46 = vunpack.i.h.bf16 %v1256_v3  ;;  %v1257_v7 = vunpack.i.l.bf16 %v1256_v3  ;;  %v771_v16 = vsel %vm1672_vm3, %v763_v1, 0.0 }
 0x71f   : > { %v774_v25 = vmax.f32 %v1568_v54, %v771_v16 }
 0x720   : > { %v536_v9 = vsel %vm1680_vm8, %v1258_v46, 0.0  ;;  %v535_v10 = vsel %vm1680_vm8, %v1257_v7, 0.0 }
 0x721   : > { %v767_v13 = vpop.permute.xlu1 %766  ;;  %v765_v14 = vpop.permute.xlu0 %764  ;;  %v1694_v17 = vmax.f32 %v517_v12, %v535_v10  ;;  %v1696_v18 = vmax.f32 %v518_v11, %v536_v9 }
 0x722   : > { %v772_v15 = vsel %vm1672_vm3, %v765_v14, 0.0  ;;  %v773_v19 = vsel %vm1672_vm3, %v767_v13, 0.0 }
 0x723   : > { %v775_v20 = vmax.f32 %v1600_v4, %v772_v15  ;;  %v548_v28 = vrot.slane %v1694_v17, 1  ;;  %v549_v29 = vrot.slane %v1696_v18, 1  ;;  %v776_v31 = vmax.f32 %v1606_v47, %v773_v19 }
 0x724   : > { %v542_v34 = vrot.slane %v1694_v17, 2  ;;  %v559_v35 = vrot.slane %v1696_v18, 2 }
 0x725   : > { %v782_v23 = vpop.permute.xlu1 %781  ;;  %v778_v24 = vpop.permute.xlu0 %777  ;;  %v790_v26 = vmax.f32 %v775_v20, %v787_v22  ;;  %v550_v52 = vsel %vm547_vm11, %v548_v28, %v549_v29 }
 0x726   : > { %v788_v27 = vsel %vm1680_vm8, %v782_v23, 0.0  ;;  %v786_v32 = vsel %vm1680_vm8, %v778_v24, 0.0  ;;  %v556_v6 = vmax.f32 %v1694_v17, %v550_v52  ;;  %v561_v46 = vsel %vm541_vm10, %v559_v35, %v542_v34 }
 0x727   : > { %v789_v30 = vmax.f32 %v774_v25, %v786_v32  ;;  %v798_v38 = vrot.slane %v790_v26, 1  ;;  %v791_v39 = vmax.f32 %v776_v31, %v788_v27  ;;  %v808_v41 = vrot.slane %v790_v26, 2 }
 0x728   : > { %v568_v20 = vrot.slane %v561_v46, 5 }
 0x729   : > { %v531_v40 = vpop.permute.xlu0 %530  ;;  %v792_v43 = vrot.slane %v789_v30, 2  ;;  %v797_v45 = vrot.slane %v789_v30, 1 }
 0x72a   : > { %v537_v51 = vsel %vm1680_vm8, %v531_v40, 0.0 }
 0x72b   : > { %v540_v53 = vmax.f32 %v519_v33, %v537_v51  ;;  %v793_v56 = vsel %vm541_vm10, %v792_v43, %v791_v39  ;;  %v799_v58 = vsel %vm547_vm11, %v797_v45, %v798_v38  ;;  %v810_v59 = vsel %vm541_vm10, %v808_v41, %v792_v43 }
 0x72c   : > { %v800_v60 = vrot.slane %v793_v56, 1  ;;  %v805_v1 = vmax.f32 %v789_v30, %v799_v58  ;;  %v809_v3 = vrot.slane %v793_v56, 2  ;;  %v815_v5 = vrot.slane %v793_v56, 5 }
 0x72d   : > { %v816_v7 = vrot.slane %v810_v59, 5  ;;  %v543_v9 = vsel %vm541_vm10, %v542_v34, %v540_v53  ;;  %v1163_v56 = vsel %vm256_vm6, 1.0, %v1357_v61 }
 0x72e   : > { %v801_v10 = vsel %vm547_vm11, %v798_v38, %v800_v60  ;;  %v811_v11 = vsel %vm541_vm10, %v809_v3, %v808_v41  ;;  %v820_v12 = vrot.slane %v809_v3, 5  ;;  %v551_v13 = vrot.slane %v543_v9, 1 }
 0x72f   : > { %v806_v14 = vmax.f32 %v790_v26, %v801_v10  ;;  %v817_v15 = vsel %vm566_vm12, %v815_v5, %v816_v7  ;;  %v818_v16 = vrot.slane %v811_v11, 5  ;;  %v560_v19 = vrot.slane %v543_v9, 2 }
 0x730   : > { %v825_v21 = vmax.f32 %v805_v1, %v817_v15  ;;  %v552_v17 = vsel %vm547_vm11, %v549_v29, %v551_v13  ;;  %v567_v22 = vrot.slane %v543_v9, 5  ;;  %v558_v33 = vmax.f32 %v540_v53, %v551_v13 }
 0x731   : > { %v819_v23 = vsel %vm566_vm12, %v816_v7, %v818_v16  ;;  %v557_v24 = vmax.f32 %v1696_v18, %v552_v17  ;;  %v562_v25 = vsel %vm541_vm10, %v560_v19, %v559_v35  ;;  %v572_v27 = vrot.slane %v560_v19, 5 }
 0x732   : > { %v826_v28 = vmax.f32 %v806_v14, %v819_v23  ;;  %v570_v31 = vrot.slane %v562_v25, 5  ;;  %v828_v26 = vsub.f32 %v825_v21, %v1568_v54  ;;  %v569_v32 = vsel %vm566_vm12, %v567_v22, %v568_v20 }
 0x733   : > { %v577_v30 = vmax.f32 %v556_v6, %v569_v32  ;;  %v807_v34 = vmax.f32 %v791_v39, %v800_v60  ;;  %v821_v38 = vsel %vm566_vm12, %v818_v16, %v820_v12 }
 0x734   : > { %v1741_v29 = vsub.f32 %v826_v28, %v1600_v4  ;;  %v571_v40 = vsel %vm566_vm12, %v568_v20, %v570_v31  ;;  %v573_v18 = vsel %vm566_vm12, %v570_v31, %v572_v27  ;;  %v1747_v35 = vsel %vm236_vm5, %v828_v26, 0.0 }
 0x735   : > { %v578_v41 = vmax.f32 %v557_v24, %v571_v40  ;;  %v579_v54 = vmax.f32 %v558_v33, %v573_v18  ;;  %864 = vrot.lane.b32.xlu1 %v1747_v35, %s1351_s28  ;;  %v1752_v39 = vmul.f32 %v1162_v55, %v1747_v35  ;;  %v580_v43 = vsub.f32 %v577_v30, %v1582_v62 }
 0x736   : > { %v854_v4 = vsel %vm840_vm4, %v1741_v29, 0.0  ;;  %v827_v45 = vmax.f32 %v807_v34, %v821_v38 }
 0x737   : > { %v1762_v51 = vsub.f32 %v578_v41, %v1585_v63  ;;  %v582_v52 = vsub.f32 %v579_v54, %v1594_v2  ;;  %v853_v53 = vsel %vm840_vm4, %v1752_v39, 0.0  ;;  %v1769_v62 = vsel %vm236_vm5, %v580_v43, 0.0 }
 0x738   : > { %586 = vrot.lane.b32.xlu0 %v1769_v62, %s1351_s28  ;;  %v1774_v48 = vmul.f32 %v1162_v55, %v1769_v62  ;;  %v830_v63 = vsub.f32 %v827_v45, %v1606_v47  ;;  %v855_v37 = vadd.f32 %v854_v4, %v853_v53  ;;  %vm1033_vm5 = vcmask 516096  }
 0x739   : > { %v1023_v2 = vsel %vm840_vm4, %v1762_v51, 0.0  ;;  %v1782_v58 = vsel %vm241_vm14, %v582_v52, 0.0 }
 0x73a   : > { %v1022_v59 = vsel %vm840_vm4, %v1774_v48, 0.0  ;;  %v1788_v55 = vsel %vm241_vm14, %v830_v63, 0.0  ;;  %v1791_v61 = vmul.f32 %v1163_v56, %v1782_v58  ;;  %vm1876_vm14 = vcmp.eq.s32.totalorder %v662_v50, 1 }
 0x73b   : > { %v1024_v47 = vadd.f32 %v1023_v2, %v1022_v59  ;;  %870 = vrot.lane.b32.xlu1 %v1788_v55, %s1351_s28  ;;  %v1796_v60 = vmul.f32 %v1163_v56, %v1788_v55 }
 0x73c   : > { %592 = vrot.lane.b32.xlu0 %v1782_v58, %s1351_s28  ;;  %v1025_v57 = vsel %vm844_vm7, %v1791_v61, 0.0 }
 0x73d   : > { %v856_v1 = vsel %vm844_vm7, %v1796_v60, 0.0  ;;  %v1026_v3 = vadd.f32 %v1025_v57, %v1024_v47 }
 0x73e   : > { %v857_v5 = vadd.f32 %v856_v1, %v855_v37 }
 0x73f   : > { %v1027_v6 = vrot.slane %v1026_v3, 4  ;;  %867 = vrot.lane.b32.xlu1 %v1741_v29, %s1351_s28 }
 0x740   : > { %v858_v46 = vrot.slane %v857_v5, 4  ;;  %589 = vrot.lane.b32.xlu0 %v1762_v51, %s1351_s28 }
 0x741   : > { %v1028_v7 = vadd.f32 %v1027_v6, %v1026_v3 }
 0x742   : > { %v859_v9 = vadd.f32 %v858_v46, %v857_v5 }
 0x743   : > { %v1029_v10 = vrot.slane %v1028_v7, 2 }
 0x744   : > { %v860_v11 = vrot.slane %v859_v9, 2 }
 0x745   : > { %v1030_v12 = vadd.f32 %v1029_v10, %v1028_v7 }
 0x746   : > { %v861_v13 = vadd.f32 %v860_v11, %v859_v9 }
 0x747   : > { %v1031_v14 = vrot.slane %v1030_v12, 1 }
 0x748   : > { %v862_v15 = vrot.slane %v861_v13, 1 }
 0x749   : > { %v1032_v16 = vadd.f32 %v1031_v14, %v1030_v12 }
 0x74a   : > { %v863_v19 = vadd.f32 %v862_v15, %v861_v13 }
 0x74b   : > { %1037 = vst.msk [vmem:[%s1811_s23 + $0x3] sm:$0x1] %vm1033_vm5, %v1032_v16 }
 0x74c   : > { %1035 = vst.msk [vmem:[%s1811_s23 + $0x1] sm:$0x1] %vm1033_vm5, %v863_v19 }
 0x7a7   : > { %v865_v20 = vpop.permute.xlu1 %864 }
 0x7a8   : > { %v866_v21 = vsel %vm267_vm0, %v865_v20, %v1747_v35 }
 0x7a9   : > { %873 = vrot.lane.b32.xlu1 %v866_v21, %s1351_s28 }
 0x7aa   : > { %v587_v17 = vpop.permute.xlu0 %586 }
 0x7ab   : > { %v588_v22 = vsel %vm267_vm0, %v587_v17, %v1769_v62 }
 0x7ac   : > { %595 = vrot.lane.b32.xlu0 %v588_v22, %s1351_s28 }
 0x7ad   : > { %v871_v23 = vpop.permute.xlu1 %870 }
 0x7ae   : > { %v872_v24 = vsel %vm267_vm0, %v871_v23, %v1788_v55  ;;  %v593_v25 = vpop.permute.xlu0 %592 }
 0x7af   : > { %877 = vrot.lane.b32.xlu1 %v872_v24, %s1351_s28  ;;  %v594_v27 = vsel %vm267_vm0, %v593_v25, %v1782_v58 }
 0x7b0   : > { %599 = vrot.lane.b32.xlu0 %v594_v27, %s1351_s28 }
 0x7b1   : > { %v868_v28 = vpop.permute.xlu1 %867 }
 0x7b2   : > { %v869_v31 = vsel %vm267_vm0, %v868_v28, %v1741_v29  ;;  %v590_v26 = vpop.permute.xlu0 %589 }
 0x7b3   : > { %875 = vrot.lane.b32.xlu1 %v869_v31, %s1351_s28  ;;  %v591_v32 = vsel %vm267_vm0, %v590_v26, %v1762_v51 }
 0x7b4   : > { %597 = vrot.lane.b32.xlu0 %v591_v32, %s1351_s28 }
 0x81b   : > { %v874_v41 = vpop.permute.xlu1 %873 }
 0x81c   : > { %v879_v54 = vsel %vm267_vm0, %v874_v41, %v1747_v35 }
 0x81e   : > { %v596_v33 = vpop.permute.xlu0 %595 }
 0x81f   : > { %v601_v30 = vsel %vm267_vm0, %v596_v33, %v1769_v62 }
 0x820   : > { %622 = vrot.lane.b32.xlu1 %v601_v30, %s1359_s16  ;;  %607 = vrot.lane.b32.xlu0 %v601_v30, %s1358_s15 }
 0x821   : > { %v878_v43 = vpop.permute.xlu1 %877 }
 0x822   : > { %v600_v34 = vpop.permute.xlu0 %599  ;;  %v881_v52 = vsel %vm267_vm0, %v878_v43, %v1788_v55 }
 0x823   : > { %v603_v38 = vsel %vm267_vm0, %v600_v34, %v1782_v58 }
 0x824   : > { %643 = vrot.lane.b32.xlu1 %v601_v30, %s1361_s24  ;;  %611 = vrot.lane.b32.xlu0 %v603_v38, %s1358_s15 }
 0x825   : > { %v876_v4 = vpop.permute.xlu1 %875 }
 0x826   : > { %v598_v40 = vpop.permute.xlu0 %597  ;;  %v880_v45 = vsel %vm267_vm0, %v876_v4, %v1741_v29 }
 0x827   : > { %v602_v18 = vsel %vm267_vm0, %v598_v40, %v1762_v51  ;;  %vm1867_vm0 = vcmp.eq.s32.totalorder %v641_v49, 1 }
 0x828   : > { %664 = vrot.lane.b32.xlu1 %v601_v30, %s1362_s25  ;;  %609 = vrot.lane.b32.xlu0 %v602_v18, %s1358_s15 }
 0x82c   : > { %885 = vrot.lane.b32.xlu1 %v879_v54, %s1358_s15  ;;  %626 = vrot.lane.b32.xlu0 %v603_v38, %s1359_s16 }
 0x830   : > { %900 = vrot.lane.b32.xlu1 %v879_v54, %s1359_s16  ;;  %624 = vrot.lane.b32.xlu0 %v602_v18, %s1359_s16 }
 0x834   : > { %915 = vrot.lane.b32.xlu1 %v879_v54, %s1361_s24  ;;  %647 = vrot.lane.b32.xlu0 %v603_v38, %s1361_s24 }
 0x838   : > { %930 = vrot.lane.b32.xlu1 %v879_v54, %s1362_s25  ;;  %645 = vrot.lane.b32.xlu0 %v602_v18, %s1361_s24 }
 0x83c   : > { %887 = vrot.lane.b32.xlu1 %v880_v45, %s1358_s15  ;;  %668 = vrot.lane.b32.xlu0 %v603_v38, %s1362_s25 }
 0x840   : > { %902 = vrot.lane.b32.xlu1 %v880_v45, %s1359_s16  ;;  %889 = vrot.lane.b32.xlu0 %v881_v52, %s1358_s15 }
 0x844   : > { %917 = vrot.lane.b32.xlu1 %v880_v45, %s1361_s24  ;;  %904 = vrot.lane.b32.xlu0 %v881_v52, %s1359_s16 }
 0x848   : > { %934 = vrot.lane.b32.xlu1 %v881_v52, %s1362_s25  ;;  %919 = vrot.lane.b32.xlu0 %v881_v52, %s1361_s24 }
 0x84c   : > { %932 = vrot.lane.b32.xlu1 %v880_v45, %s1362_s25  ;;  %666 = vrot.lane.b32.xlu0 %v602_v18, %s1362_s25 }
 0x892   : > { %v623_v53 = vpop.permute.xlu1 %622  ;;  %v608_v56 = vpop.permute.xlu0 %607 }
 0x893   : > { %v616_v63 = vsel %vm1672_vm3, %v608_v56, 0.0  ;;  %v631_v37 = vsel %vm1680_vm8, %v623_v53, 0.0 }
 0x894   : > { %v619_v2 = vmax.f32 %v1769_v62, %v616_v63 }
 0x896   : > { %v644_v47 = vpop.permute.xlu1 %643  ;;  %v634_v57 = vmax.f32 %v619_v2, %v631_v37  ;;  %v612_v1 = vpop.permute.xlu0 %611 }
 0x897   : > { %v652_v3 = vsel %vm1867_vm0, %v644_v47, 0.0  ;;  %v618_v14 = vsel %vm1672_vm3, %v612_v1, 0.0 }
 0x898   : > { %v655_v5 = vmax.f32 %v634_v57, %v652_v3  ;;  %v621_v20 = vmax.f32 %v1782_v58, %v618_v14 }
 0x89a   : > { %v665_v6 = vpop.permute.xlu1 %664  ;;  %v610_v36 = vpop.permute.xlu0 %609 }
 0x89b   : > { %v673_v49 = vsel %vm1876_vm14, %v665_v6, 0.0  ;;  %v617_v43 = vsel %vm1672_vm3, %v610_v36, 0.0 }
 0x89c   : > { %v1882_v46 = vmax.f32 %v655_v5, %v673_v49  ;;  %v620_v63 = vmax.f32 %v1762_v51, %v617_v43 }
 0x89e   : > { %v886_v7 = vpop.permute.xlu1 %885  ;;  %v627_v9 = vpop.permute.xlu0 %626  ;;  %v1905_v58 = vrot.slane %v1882_v46, 2  ;;  %v684_v6 = vrot.slane %v1882_v46, 1 }
 0x89f   : > { %v894_v12 = vsel %vm1672_vm3, %v886_v7, 0.0  ;;  %v633_v19 = vsel %vm1680_vm8, %v627_v9, 0.0 }
 0x8a0   : > { %v897_v44 = vmax.f32 %v1747_v35, %v894_v12  ;;  %v636_v24 = vmax.f32 %v621_v20, %v633_v19 }
 0x8a2   : > { %v901_v10 = vpop.permute.xlu1 %900  ;;  %v625_v11 = vpop.permute.xlu0 %624 }
 0x8a3   : > { %v909_v42 = vsel %vm1680_vm8, %v901_v10, 0.0  ;;  %v632_v53 = vsel %vm1680_vm8, %v625_v11, 0.0 }
 0x8a4   : > { %v912_v16 = vmax.f32 %v897_v44, %v909_v42  ;;  %v635_v3 = vmax.f32 %v620_v63, %v632_v53 }
 0x8a6   : > { %v916_v50 = vpop.permute.xlu1 %915  ;;  %v648_v13 = vpop.permute.xlu0 %647 }
 0x8a7   : > { %v924_v15 = vsel %vm1867_vm0, %v916_v50, 0.0  ;;  %v654_v35 = vsel %vm1867_vm0, %v648_v13, 0.0 }
 0x8a8   : > { %v927_v21 = vmax.f32 %v912_v16, %v924_v15  ;;  %v657_v27 = vmax.f32 %v636_v24, %v654_v35 }
 0x8aa   : > { %v931_v17 = vpop.permute.xlu1 %930  ;;  %v646_v22 = vpop.permute.xlu0 %645 }
 0x8ab   : > { %v939_v23 = vsel %vm1876_vm14, %v931_v17, 0.0  ;;  %v653_v0 = vsel %vm1867_vm0, %v646_v22, 0.0 }
 0x8ac   : > { %v1900_v25 = vmax.f32 %v927_v21, %v939_v23  ;;  %v656_v7 = vmax.f32 %v635_v3, %v653_v0 }
 0x8ae   : > { %v888_v28 = vpop.permute.xlu1 %887  ;;  %v669_v31 = vpop.permute.xlu0 %668  ;;  %v945_v49 = vrot.slane %v1900_v25, 2  ;;  %v950_v59 = vrot.slane %v1900_v25, 1 }
 0x8af   : > { %v675_v26 = vsel %vm1876_vm14, %v669_v31, 0.0  ;;  %v895_v4 = vsel %vm1672_vm3, %v888_v28, 0.0 }
 0x8b0   : > { %v678_v32 = vmax.f32 %v657_v27, %v675_v26  ;;  %v898_v2 = vmax.f32 %v1741_v29, %v895_v4 }
 0x8b2   : > { %v1909_v33 = vsel %vm541_vm10, %v1905_v58, %v678_v32  ;;  %v903_v30 = vpop.permute.xlu1 %902  ;;  %v890_v34 = vpop.permute.xlu0 %889 }
 0x8b3   : > { %v687_v38 = vrot.slane %v1909_v33, 1  ;;  %v896_v18 = vsel %vm1672_vm3, %v890_v34, 0.0  ;;  %v910_v56 = vsel %vm1680_vm8, %v903_v30, 0.0  ;;  %v1943_v42 = vrot.slane %v1909_v33, 2 }
 0x8b4   : > { %v899_v52 = vmax.f32 %v1788_v55, %v896_v18  ;;  %v913_v5 = vmax.f32 %v898_v2, %v910_v56  ;;  %v702_v13 = vrot.slane %v1909_v33, 5  ;;  %v728_v19 = vrot.slane %v1909_v33, 4 }
 0x8b5   : > { %v1914_v40 = vmax.f32 %v678_v32, %v687_v38 }
 0x8b6   : > { %v918_v41 = vpop.permute.xlu1 %917  ;;  %v905_v54 = vpop.permute.xlu0 %904 }
 0x8b7   : > { %v911_v45 = vsel %vm1680_vm8, %v905_v54, 0.0  ;;  %v925_v1 = vsel %vm1867_vm0, %v918_v41, 0.0 }
 0x8b8   : > { %v914_v37 = vmax.f32 %v899_v52, %v911_v45  ;;  %v928_v9 = vmax.f32 %v913_v5, %v925_v1 }
 0x8ba   : > { %v935_v47 = vpop.permute.xlu1 %934  ;;  %v920_v57 = vpop.permute.xlu0 %919 }
 0x8bb   : > { %v926_v55 = vsel %vm1867_vm0, %v920_v57, 0.0  ;;  %v941_v36 = vsel %vm1876_vm14, %v935_v47, 0.0 }
 0x8bc   : > { %v929_v8 = vmax.f32 %v914_v37, %v926_v55 }
 0x8be   : > { %v944_v10 = vmax.f32 %v929_v8, %v941_v36  ;;  %v933_v11 = vpop.permute.xlu1 %932  ;;  %v667_v12 = vpop.permute.xlu0 %666 }
 0x8bf   : > { %v940_v44 = vsel %vm1876_vm14, %v933_v11, 0.0  ;;  %v674_v50 = vsel %vm1876_vm14, %v667_v12, 0.0 }
 0x8c0   : > { %v946_v14 = vsel %vm541_vm10, %v945_v49, %v944_v10  ;;  %v943_v15 = vmax.f32 %v928_v9, %v940_v44  ;;  %v1951_v16 = vmax.f32 %v656_v7, %v674_v50 }
 0x8c1   : > { %v953_v20 = vrot.slane %v946_v14, 1  ;;  %v962_v21 = vrot.slane %v946_v14, 2  ;;  %v968_v17 = vrot.slane %v946_v14, 5  ;;  %v992_v22 = vrot.slane %v946_v14, 4 }
 0x8c2   : > { %v951_v35 = vrot.slane %v943_v15, 1  ;;  %v961_v23 = vrot.slane %v943_v15, 2  ;;  %v685_v24 = vrot.slane %v1951_v16, 1  ;;  %v695_v31 = vrot.slane %v1951_v16, 2 }
 0x8c3   : > { %v960_v27 = vmax.f32 %v944_v10, %v953_v20  ;;  %v973_v62 = vrot.slane %v962_v21, 5  ;;  %v997_v28 = vrot.slane %v962_v21, 4 }
 0x8c4   : > { %v952_v26 = vsel %vm547_vm11, %v950_v59, %v951_v35  ;;  %v954_v32 = vsel %vm547_vm11, %v951_v35, %v953_v20  ;;  %v963_v30 = vsel %vm541_vm10, %v961_v23, %v945_v49  ;;  %v964_v34 = vsel %vm541_vm10, %v962_v21, %v961_v23 }
 0x8c5   : > { %v958_v18 = vmax.f32 %v1900_v25, %v952_v26  ;;  %v959_v41 = vmax.f32 %v943_v15, %v954_v32  ;;  %v969_v54 = vrot.slane %v963_v30, 5  ;;  %v971_v43 = vrot.slane %v964_v34, 5 }
 0x8c6   : > { %v983_v4 = vsel %vm715_vm1, %v945_v49, %v961_v23  ;;  %v985_v45 = vsel %vm715_vm1, %v961_v23, %v962_v21  ;;  %v993_v52 = vrot.slane %v963_v30, 4  ;;  %v995_v53 = vrot.slane %v964_v34, 4 }
 0x8c7   : > { %v970_v56 = vsel %vm566_vm12, %v968_v17, %v969_v54  ;;  %v972_v63 = vsel %vm566_vm12, %v969_v54, %v971_v43  ;;  %v974_v2 = vsel %vm566_vm12, %v971_v43, %v973_v62  ;;  %v686_v37 = vsel %vm547_vm11, %v684_v6, %v685_v24 }
 0x8c8   : > { %v978_v47 = vmax.f32 %v958_v18, %v970_v56  ;;  %v979_v57 = vmax.f32 %v959_v41, %v972_v63  ;;  %v980_v25 = vmax.f32 %v960_v27, %v974_v2  ;;  %v994_v0 = vsel %vm727_vm2, %v992_v22, %v993_v52 }
 0x8c9   : > { %v996_v1 = vsel %vm727_vm2, %v993_v52, %v995_v53  ;;  %v998_v55 = vsel %vm727_vm2, %v995_v53, %v997_v28  ;;  %v688_v3 = vsel %vm547_vm11, %v685_v24, %v687_v38  ;;  %v692_v5 = vmax.f32 %v1882_v46, %v686_v37 }
 0x8ca   : > { %v989_v8 = vmax.f32 %v978_v47, %v983_v4  ;;  %v990_v36 = vmax.f32 %v979_v57, %v985_v45  ;;  %v991_v49 = vmax.f32 %v980_v25, %v962_v21  ;;  %v693_v6 = vmax.f32 %v1951_v16, %v688_v3 }
 0x8cb   : > { %v697_v7 = vsel %vm541_vm10, %v695_v31, %v1905_v58  ;;  %v698_v9 = vsel %vm541_vm10, %v1943_v42, %v695_v31  ;;  %v718_v10 = vsel %vm715_vm1, %v1905_v58, %v695_v31  ;;  %v720_v33 = vsel %vm715_vm1, %v695_v31, %v1943_v42 }
 0x8cc   : > { %v1002_v38 = vmax.f32 %v989_v8, %v994_v0  ;;  %v1003_v11 = vmax.f32 %v990_v36, %v996_v1  ;;  %v1004_v46 = vmax.f32 %v991_v49, %v998_v55  ;;  %v703_v12 = vrot.slane %v697_v7, 5 }
 0x8cd   : > { %v707_v59 = vrot.slane %v1943_v42, 5  ;;  %v705_v44 = vrot.slane %v698_v9, 5  ;;  %v729_v50 = vrot.slane %v697_v7, 4  ;;  %v731_v14 = vrot.slane %v698_v9, 4 }
 0x8ce   : > { %v1008_v15 = vmul.f32 %v1774_v48, %v1002_v38  ;;  %v1009_v16 = vmul.f32 %v1003_v11, %v1762_v51  ;;  %v1010_v20 = vmul.f32 %v1791_v61, %v1004_v46  ;;  %v704_v58 = vsel %vm566_vm12, %v702_v13, %v703_v12 }
 0x8cf   : > { %v706_v21 = vsel %vm566_vm12, %v703_v12, %v705_v44  ;;  %v708_v17 = vsel %vm566_vm12, %v705_v44, %v707_v59  ;;  %v712_v22 = vmax.f32 %v692_v5, %v704_v58  ;;  %v730_v35 = vsel %vm727_vm2, %v728_v19, %v729_v50 }
 0x8d0   : > { %v733_v23 = vrot.slane %v1943_v42, 4  ;;  %v1011_v24 = vsel %vm840_vm4, %v1008_v15, 0.0  ;;  %v1012_v27 = vsel %vm840_vm4, %v1009_v16, 0.0  ;;  %v713_v48 = vmax.f32 %v693_v6, %v706_v21 }
 0x8d1   : > { %v1013_v62 = vadd.f32 %v1012_v27, %v1011_v24  ;;  %v714_v51 = vmax.f32 %v1914_v40, %v708_v17  ;;  %v724_v61 = vmax.f32 %v712_v22, %v718_v10  ;;  %v732_v13 = vsel %vm727_vm2, %v729_v50, %v731_v14 }
 0x8d2   : > { %v1014_v28 = vsel %vm844_vm7, %v1010_v20, 0.0  ;;  %v725_v31 = vmax.f32 %v713_v48, %v720_v33  ;;  %v734_v26 = vsel %vm727_vm2, %v731_v14, %v733_v23 }
 0x8d3   : > { %v1015_v32 = vadd.f32 %v1014_v28, %v1013_v62  ;;  %v726_v19 = vmax.f32 %v714_v51, %v1943_v42  ;;  %v738_v30 = vmax.f32 %v724_v61, %v730_v35 }
 0x8d4   : > { %v739_v34 = vmax.f32 %v725_v31, %v732_v13 }
 0x8d5   : > { %v1016_v18 = vrot.slane %v1015_v32, 4  ;;  %v740_v41 = vmax.f32 %v726_v19, %v734_v26  ;;  %v837_v54 = vmul.f32 %v1752_v39, %v738_v30 }
 0x8d6   : > { %v838_v40 = vmul.f32 %v1741_v29, %v739_v34 }
 0x8d7   : > { %v839_v43 = vmul.f32 %v1796_v60, %v740_v41  ;;  %v841_v4 = vsel %vm840_vm4, %v837_v54, 0.0  ;;  %v1017_v45 = vadd.f32 %v1016_v18, %v1015_v32 }
 0x8d8   : > { %v842_v52 = vsel %vm840_vm4, %v838_v40, 0.0 }
 0x8d9   : > { %v843_v53 = vadd.f32 %v842_v52, %v841_v4  ;;  %v1018_v42 = vrot.slane %v1017_v45, 2  ;;  %v845_v56 = vsel %vm844_vm7, %v839_v43, 0.0 }
 0x8db   : > { %v846_v63 = vadd.f32 %v845_v56, %v843_v53  ;;  %v1019_v39 = vadd.f32 %v1018_v42, %v1017_v45 }
 0x8dd   : > { %v847_v2 = vrot.slane %v846_v63, 4  ;;  %v1020_v37 = vrot.slane %v1019_v39, 1 }
 0x8df   : > { %v848_v29 = vadd.f32 %v847_v2, %v846_v63  ;;  %v1021_v60 = vadd.f32 %v1020_v37, %v1019_v39 }
 0x8e1   : > { %v849_v47 = vrot.slane %v848_v29, 2  ;;  %1036 = vst.msk [vmem:[%s1811_s23 + $0x2] sm:$0x1] %vm1033_vm5, %v1021_v60 }
 0x8e3   : > { %v850_v57 = vadd.f32 %v849_v47, %v848_v29 }
 0x8e5   : > { %v851_v25 = vrot.slane %v850_v57, 1 }
 0x8e7   : > { %v852_v0 = vadd.f32 %v851_v25, %v850_v57 }
 0x8e9   : > { %1034 = vst.msk [vmem:[%s1811_s23] sm:$0x1] %vm1033_vm5, %v852_v0 }
 0x8ea   : > { %1284 = shalt.err (!%p1281_p5)
}
 0x8eb   : > { %s1285_s7 = scalar_lea.hbm %s2012_s30, 64  ;;  %s1289_s16 = scalar_lea.hbm %s2065_s2, 128 }
 0x8ec   : > { %p1286_p6 = scmp.ne.s32.totalorder %s2012_s30, %s1285_s7  ;;  %p1290_p10 = scmp.lt.u32.totalorder %s2012_s30, %s2065_s2 }
 0x8ed   : > { %p1291_p11 = scmp.lt.u32.totalorder %s1289_s16, %s1285_s7  ;;  %p1293_p13 = scmp.lt.u32.totalorder %s1285_s7, %s2012_s30 }
 0x8ee   : > { %p1287_p7 = pnand %p1286_p6, %p1419_p4 }
 0x8ef   : > { %p1292_p12 = por %p1291_p11, %p1290_p10 }
 0x8f0   : > { %p1288_p9 = pneg %p1287_p7 }
 0x8f1   : > { %p1294_p0 = por %p1293_p13, %p1292_p12 }
 0x8f3   : > { %p1295_p1 = pnand %p1294_p0, %p1288_p9 }
 0x8f5   : > { %1298 = shalt.err (!%p1295_p1)
}
 0x8f6   : > { %1172 = dma.vmem_to_hbm [thread:$0]  (%p1419_p4), %s2014_s27, 64, %s2012_s30, %s1039_s3  }
 0x8f7 PF: > { %p1178_p2 = scmp.ge.s32.totalorder %s1349_s14, 2  ;;  %s1065_s23 = sand.u32 1, %s1329_s9  }
 0x8f8   : > { %s1066_s24 = scalar_lea.sflag [#allocation3], %s1065_s23 }
 0x8f9   : > { %p1175_p3 = pnand %p1178_p2, %p1426_p8 }
 0x8fb   : > { %1324 = dma.done.wait (!%p1175_p3), %s1066_s24, 64  }
 0x8fc   : > { %1326 = vsyncadd (!%p1175_p3), %s1066_s24, 4294967232  ;;  %s15_s14 = sadd.s32 1, %s1349_s14   ;;  %s2076_s9 = smov %s1333_s10 }
 0x8fd   : > { %p12_p5 = scmp.ge.s32.totalorder %s15_s14, 4   ;;  %s2077_s10 = smov %s1337_s11 }
 0x8fe   : > { %s2078_s11 = smov %s1432_s22  ;;  %s2079_s12 = smov %s1345_s13 }
 0x8ff   : > { %s2080_s13 = smov %s2082_s17  ;;  %14 = sbr.rel (!%p12_p5) target bundleno = 4 (0x4), region = 66 }
 0x906   :  { %1071 = vsyncpa [#allocation3], 1 }
 0x907   :  { %1073 = vsyncpa [#allocation3 + $0x1], 1 }

</bundles_post_ra>
